<compile_context>
chip_gen: v6e
topology: v6e:2x2x1
jax: 0.10.0
libtpu: 0.0.40
codegen_flags: <defaults>
</compile_context>

<pallas_src>
from functools import partial

import jax
import jax.numpy as jnp
from jax.experimental import pallas as pl
from jax.experimental.pallas import tpu as pltpu


# Keep f32 for exact (1e-4) parity with the f32 reference.  Switch to
# jnp.bfloat16 for higher MXU throughput once a looser tolerance is OK
# (accumulation stays f32 via preferred_element_type).
MATMUL_DTYPE = jnp.float32

# Tap order (dy, dx) matches weight packing: tap index t = (dy+1)*3 + (dx+1).
_TAP_OFFSETS = tuple((dy, dx) for dy in (-1, 0, 1) for dx in (-1, 0, 1))


def _dense_block_kernel(x_ref, *args, H, W, Cin0, Cmid, n_layers):
    """args = (w0, b0, w1, b1, ..., out_ref).

    Shapes (channels on sublanes, flattened H*W on lanes):
      x_ref   : (1, Cin0, H*W)
      w_i     : (9, Cmid, Cin_i)   per-tap weight slabs, tap = ky*3 + kx
      b_i     : (Cmid, 1)
      out_ref : (1, Cmid, H*W)
    """
    out_ref = args[-1]
    wb = args[:-1]
    HW = H * W

    # Column-validity masks for horizontally shifted taps.  Vertical
    # out-of-bounds sources read the explicit zero lane-padding built in
    # conv3x3, so only these two masks are needed.
    col = jax.lax.broadcasted_iota(jnp.int32, (1, HW), 1) % W
    mask_l = jnp.where(col >= 1, 1.0, 0.0)        # dx = -1: output col 0 invalid
    mask_r = jnp.where(col <= W - 2, 1.0, 0.0)    # dx = +1: output col W-1 invalid

    def conv3x3(cur, w_ref, b_ref):
        # cur: (cin, HW).  3x3 / stride 1 / pad 1 conv as 9 accumulating
        # (Cmid, cin) @ (cin, HW) MXU dots over lane-shifted views of `cur`.
        cin = cur.shape[0]
        cur = cur.astype(MATMUL_DTYPE)
        zpad = jnp.zeros((cin, W + 1), MATMUL_DTYPE)
        # One lane-padded register copy per layer; taps are static slices.
        padded = jnp.concatenate([zpad, cur, zpad], axis=1)   # (cin, HW + 2W + 2)
        y = None
        for t, (dy, dx) in enumerate(_TAP_OFFSETS):
            start = (W + 1) + dy * W + dx
            tap = padded[:, start:start + HW]                  # (cin, HW)
            contrib = jnp.dot(w_ref[t].astype(MATMUL_DTYPE), tap,
                              preferred_element_type=jnp.float32)
            if dx == -1:
                contrib = contrib * mask_l
            elif dx == 1:
                contrib = contrib * mask_r
            y = contrib if y is None else y + contrib
        return y + b_ref[...]                                  # (Cmid, HW) f32

    # ---- layer 0 -----------------------------------------------------------
    y = conv3x3(x_ref[0], wb[0], wb[1])                        # (Cmid, HW)
    run_sum = y            # running sum of all conv outputs -> O(1) mean update

    # ---- layers 1 .. n-1 : mean(previous maps) ++ SiLU(latest), then conv --
    for i in range(1, n_layers):
        mean = run_sum * (1.0 / i)
        silu = y * jax.nn.sigmoid(y)
        # channel concat == aligned sublane stack (Cmid = 8 = one sublane group)
        cat = jnp.concatenate([mean, silu], axis=0)            # (2*Cmid, HW)
        y = conv3x3(cat, wb[2 * i], wb[2 * i + 1])
        run_sum = run_sum + y

    out_ref[0] = y.astype(out_ref.dtype)


class DenseBlockPallas:
    """JAX/Pallas port of the PyTorch DenseBlock (NCHW in / NCHW out)."""

    def __init__(self, conv_params, key):
        # conv_params: list of (in_ch, out_ch, kernel, stride, padding)
        self.cin0 = conv_params[0][0]
        self.cmid = conv_params[0][1]
        self.params = []
        for idx, (cin, cout, k, s, p) in enumerate(conv_params):
            assert k == 3 and s == 1 and p == 1, "kernel supports 3x3/s1/p1 only"
            assert cout == self.cmid, "all convs must share out_channels"
            if idx > 0:
                assert cin == 2 * self.cmid, "conv_i (i>0) takes mean(C)+silu(C)"
            key, wk, bk = jax.random.split(key, 3)
            bound = (cin * k * k) ** -0.5                      # PyTorch-style init
            w_oihw = jax.random.uniform(wk, (cout, cin, k, k), jnp.float32,
                                        -bound, bound)
            bias = jax.random.uniform(bk, (cout,), jnp.float32, -bound, bound)
            # OIHW -> (ky, kx, cout, cin) -> (9, cout, cin): per-tap (Cmid, cin)
            # slabs matching the tap-accumulation loop inside the kernel.
            w_taps = jnp.transpose(w_oihw, (2, 3, 0, 1)).reshape(9, cout, cin)
            self.params.append((w_taps, bias.reshape(cout, 1)))

    def __call__(self, x_nchw):
        N, C0, H, W = x_nchw.shape
        assert C0 == self.cin0
        # torchvision Resize((W, W)) is an identity here: square input and all
        # convs are 3x3/stride1/pad1, so every stored map already is (W, W).
        assert H == W, "square inputs required (Resize((W,W)) identity assumption)"
        # TODO(synk): general bilinear resize for size-changing / non-square cases.
        Cmid = self.cmid
        n_layers = len(self.params)
        HW = H * W

        # NCHW with H,W flattened IS the channels-on-sublanes / pixels-on-lanes
        # layout the kernel wants -> free reshape, no HBM transposes.
        x = x_nchw.reshape(N, C0, HW)

        in_specs = [pl.BlockSpec((1, C0, HW), lambda n: (n, 0, 0))]
        flat_wb = []
        for (w_taps, b_col) in self.params:
            in_specs.append(pl.BlockSpec(w_taps.shape, lambda n: (0, 0, 0)))
            in_specs.append(pl.BlockSpec(b_col.shape, lambda n: (0, 0)))
            flat_wb += [w_taps, b_col]

        kernel = partial(_dense_block_kernel, H=H, W=W, Cin0=C0,
                         Cmid=Cmid, n_layers=n_layers)

        out = pl.pallas_call(
            kernel,
            out_shape=jax.ShapeDtypeStruct((N, Cmid, HW), x.dtype),
            grid_spec=pltpu.PrefetchScalarGridSpec(
                num_scalar_prefetch=0,
                grid=(N,),                       # batch elems are independent
                in_specs=in_specs,
                out_specs=pl.BlockSpec((1, Cmid, HW), lambda n: (n, 0, 0)),
            ),
            compiler_params=pltpu.CompilerParams(
                dimension_semantics=("parallel",)),   # v7x: one batch elem per TC
        )(x, *flat_wb)

        # (N, Cmid, H*W) -> NCHW is a pure reshape (lane-dense output block).
        return out.reshape(N, Cmid, H, W)

    # Pure-JAX reference (same params, original stack/mean semantics).
    def reference(self, x_nchw):
        def conv_ref(x_nhwc, w_taps, b_col):
            _, cout, cin = w_taps.shape
            w_hwio = jnp.transpose(w_taps.reshape(3, 3, cout, cin), (0, 1, 3, 2))
            y = jax.lax.conv_general_dilated(
                x_nhwc, w_hwio, window_strides=(1, 1), padding=((1, 1), (1, 1)),
                dimension_numbers=("NHWC", "HWIO", "NHWC"))
            return y + b_col[:, 0]

        x = jnp.transpose(x_nchw, (0, 2, 3, 1))
        x = conv_ref(x, *self.params[0])
        concat_maps = [x]
        for i in range(1, len(self.params)):
            mean = jnp.mean(jnp.stack(concat_maps, axis=0), axis=0)
            silu = x * jax.nn.sigmoid(x)
            x = conv_ref(jnp.concatenate([mean, silu], axis=-1), *self.params[i])
            concat_maps.append(x)
        return jnp.transpose(x, (0, 3, 1, 2))


if __name__ == "__main__":
    key = jax.random.PRNGKey(0)
    key, xk, pk = jax.random.split(key, 3)

    # torch.nn.Conv2d(in, out, kernel, stride, padding) params.
    # conv0: 4 -> 8; subsequent inputs = mean(8) + silu(8) = 16 -> 8.
    conv_params = [(4, 8, 3, 1, 1), (16, 8, 3, 1, 1), (16, 8, 3, 1, 1)]

    x = jax.random.normal(xk, (2, 4, 16, 16), jnp.float32)      # NCHW input
    block = DenseBlockPallas(conv_params, pk)

    out = jax.block_until_ready(block(x))
    ref = jax.block_until_ready(block.reference(x))

    assert out.shape == (2, 8, 16, 16), out.shape
    assert jnp.allclose(out, ref, atol=1e-4, rtol=1e-4), \
        float(jnp.max(jnp.abs(out - ref)))
    print("KERNEL_OK")
</pallas_src>

<mosaic_0001>
module attributes {stable_mosaic.version = 11 : i64} {
  func.func @_dense_block_kernel(%arg0: i32, %arg1: memref<1x4x256xf32, #tpu.memory_space<vmem>>, %arg2: memref<9x8x4xf32, #tpu.memory_space<vmem>>, %arg3: memref<8x1xf32, #tpu.memory_space<vmem>>, %arg4: memref<9x8x16xf32, #tpu.memory_space<vmem>>, %arg5: memref<8x1xf32, #tpu.memory_space<vmem>>, %arg6: memref<9x8x16xf32, #tpu.memory_space<vmem>>, %arg7: memref<8x1xf32, #tpu.memory_space<vmem>>, %arg8: memref<1x8x256xf32, #tpu.memory_space<vmem>>) attributes {dimension_semantics = [#tpu.dimension_semantics<parallel>], iteration_bounds = array<i64: 2>, scalar_prefetch = 0 : i64, scratch_operands = 0 : i64, tpu.core_type = #tpu.core_type<tc>, window_params = [{transform_indices = @transform_0, window_bounds = array<i64: 1, 4, 256>}, {pipeline_mode = #tpu.pipeline_mode<synchronous>, transform_indices = @transform_1, window_bounds = array<i64: 9, 8, 4>}, {pipeline_mode = #tpu.pipeline_mode<synchronous>, transform_indices = @transform_2, window_bounds = array<i64: 8, 1>}, {pipeline_mode = #tpu.pipeline_mode<synchronous>, transform_indices = @transform_3, window_bounds = array<i64: 9, 8, 16>}, {pipeline_mode = #tpu.pipeline_mode<synchronous>, transform_indices = @transform_4, window_bounds = array<i64: 8, 1>}, {pipeline_mode = #tpu.pipeline_mode<synchronous>, transform_indices = @transform_5, window_bounds = array<i64: 9, 8, 16>}, {pipeline_mode = #tpu.pipeline_mode<synchronous>, transform_indices = @transform_6, window_bounds = array<i64: 8, 1>}, {transform_indices = @transform_7, window_bounds = array<i64: 1, 8, 256>}]} {
    %0 = tpu.iota {dimensions = array<i32: 1>} : vector<1x256xi32>
    %c16_i32 = arith.constant 16 : i32
    %c0_i32 = arith.constant 0 : i32
    %1 = arith.cmpi eq, %c16_i32, %c0_i32 : i32
    %c1_i32 = arith.constant 1 : i32
    %2 = arith.select %1, %c1_i32, %c16_i32 : i32
    %3 = vector.broadcast %2 : i32 to vector<1x256xi32>
    %4 = arith.remsi %0, %3 : vector<1x256xi32>
    %c0_i32_0 = arith.constant 0 : i32
    %5 = vector.broadcast %c0_i32_0 : i32 to vector<1x256xi32>
    %6 = arith.cmpi ne, %4, %5 : vector<1x256xi32>
    %c0_i32_1 = arith.constant 0 : i32
    %7 = vector.broadcast %c0_i32_1 : i32 to vector<1x256xi32>
    %8 = arith.cmpi slt, %4, %7 : vector<1x256xi32>
    %c0_i32_2 = arith.constant 0 : i32
    %9 = arith.cmpi slt, %2, %c0_i32_2 : i32
    %10 = vector.broadcast %9 : i1 to vector<1x256xi1>
    %11 = vector.broadcast %10 : vector<1x256xi1> to vector<1x256xi1>
    %12 = arith.xori %8, %11 : vector<1x256xi1>
    %13 = arith.andi %12, %6 : vector<1x256xi1>
    %14 = vector.broadcast %2 : i32 to vector<1x256xi32>
    %15 = arith.addi %4, %14 : vector<1x256xi32>
    %16 = arith.select %13, %15, %4 : vector<1x256xi1>, vector<1x256xi32>
    %c1_i32_3 = arith.constant 1 : i32
    %17 = vector.broadcast %c1_i32_3 : i32 to vector<1x256xi32>
    %18 = arith.cmpi sge, %16, %17 : vector<1x256xi32>
    %cst = arith.constant 1.000000e+00 : f32
    %cst_4 = arith.constant 0.000000e+00 : f32
    %19 = vector.broadcast %cst : f32 to vector<1x256xf32>
    %20 = vector.broadcast %cst_4 : f32 to vector<1x256xf32>
    %21 = arith.select %18, %19, %20 : vector<1x256xi1>, vector<1x256xf32>
    %c14_i32 = arith.constant 14 : i32
    %22 = vector.broadcast %c14_i32 : i32 to vector<1x256xi32>
    %23 = arith.cmpi sle, %16, %22 : vector<1x256xi32>
    %cst_5 = arith.constant 1.000000e+00 : f32
    %cst_6 = arith.constant 0.000000e+00 : f32
    %24 = vector.broadcast %cst_5 : f32 to vector<1x256xf32>
    %25 = vector.broadcast %cst_6 : f32 to vector<1x256xf32>
    %26 = arith.select %23, %24, %25 : vector<1x256xi1>, vector<1x256xf32>
    %c0 = arith.constant 0 : index
    %c0_7 = arith.constant 0 : index
    %c0_8 = arith.constant 0 : index
    %27 = vector.load %arg1[%c0, %c0_7, %c0_8] : memref<1x4x256xf32, #tpu.memory_space<vmem>>, vector<1x4x256xf32>
    %28 = vector.shape_cast %27 : vector<1x4x256xf32> to vector<4x256xf32>
    %cst_9 = arith.constant 0.000000e+00 : f32
    %29 = vector.broadcast %cst_9 : f32 to vector<4x17xf32>
    %30 = tpu.concatenate %29, %28, %29 in 1 : vector<4x17xf32>, vector<4x256xf32>, vector<4x17xf32> -> vector<4x290xf32>
    %31 = vector.extract_strided_slice %30 {offsets = [0, 0], sizes = [4, 256], strides = [1, 1]} : vector<4x290xf32> to vector<4x256xf32>
    %c0_10 = arith.constant 0 : index
    %c0_11 = arith.constant 0 : index
    %c0_12 = arith.constant 0 : index
    %32 = vector.load %arg2[%c0_10, %c0_11, %c0_12] : memref<9x8x4xf32, #tpu.memory_space<vmem>>, vector<1x8x4xf32>
    %33 = vector.shape_cast %32 : vector<1x8x4xf32> to vector<8x4xf32>
    %cst_13 = arith.constant dense<0.000000e+00> : vector<8x256xf32>
    %34 = tpu.matmul %33, %31, %cst_13 {dimension_numbers = #tpu.dot_dimension_numbers<[1], [0], [0], [1], [0, 0, 1, 1], [], []>} : vector<8x4xf32>, vector<4x256xf32>, vector<8x256xf32> -> vector<8x256xf32>
    %35 = vector.broadcast %21 : vector<1x256xf32> to vector<8x256xf32>
    %36 = arith.mulf %34, %35 : vector<8x256xf32>
    %37 = vector.extract_strided_slice %30 {offsets = [0, 1], sizes = [4, 256], strides = [1, 1]} : vector<4x290xf32> to vector<4x256xf32>
    %c1 = arith.constant 1 : index
    %c0_14 = arith.constant 0 : index
    %c0_15 = arith.constant 0 : index
    %38 = vector.load %arg2[%c1, %c0_14, %c0_15] : memref<9x8x4xf32, #tpu.memory_space<vmem>>, vector<1x8x4xf32>
    %39 = vector.shape_cast %38 : vector<1x8x4xf32> to vector<8x4xf32>
    %cst_16 = arith.constant dense<0.000000e+00> : vector<8x256xf32>
    %40 = tpu.matmul %39, %37, %cst_16 {dimension_numbers = #tpu.dot_dimension_numbers<[1], [0], [0], [1], [0, 0, 1, 1], [], []>} : vector<8x4xf32>, vector<4x256xf32>, vector<8x256xf32> -> vector<8x256xf32>
    %41 = arith.addf %36, %40 : vector<8x256xf32>
    %42 = vector.extract_strided_slice %30 {offsets = [0, 2], sizes = [4, 256], strides = [1, 1]} : vector<4x290xf32> to vector<4x256xf32>
    %c2 = arith.constant 2 : index
    %c0_17 = arith.constant 0 : index
    %c0_18 = arith.constant 0 : index
    %43 = vector.load %arg2[%c2, %c0_17, %c0_18] : memref<9x8x4xf32, #tpu.memory_space<vmem>>, vector<1x8x4xf32>
    %44 = vector.shape_cast %43 : vector<1x8x4xf32> to vector<8x4xf32>
    %cst_19 = arith.constant dense<0.000000e+00> : vector<8x256xf32>
    %45 = tpu.matmul %44, %42, %cst_19 {dimension_numbers = #tpu.dot_dimension_numbers<[1], [0], [0], [1], [0, 0, 1, 1], [], []>} : vector<8x4xf32>, vector<4x256xf32>, vector<8x256xf32> -> vector<8x256xf32>
    %46 = vector.broadcast %26 : vector<1x256xf32> to vector<8x256xf32>
    %47 = arith.mulf %45, %46 : vector<8x256xf32>
    %48 = arith.addf %41, %47 : vector<8x256xf32>
    %49 = vector.extract_strided_slice %30 {offsets = [0, 16], sizes = [4, 256], strides = [1, 1]} : vector<4x290xf32> to vector<4x256xf32>
    %c3 = arith.constant 3 : index
    %c0_20 = arith.constant 0 : index
    %c0_21 = arith.constant 0 : index
    %50 = vector.load %arg2[%c3, %c0_20, %c0_21] : memref<9x8x4xf32, #tpu.memory_space<vmem>>, vector<1x8x4xf32>
    %51 = vector.shape_cast %50 : vector<1x8x4xf32> to vector<8x4xf32>
    %cst_22 = arith.constant dense<0.000000e+00> : vector<8x256xf32>
    %52 = tpu.matmul %51, %49, %cst_22 {dimension_numbers = #tpu.dot_dimension_numbers<[1], [0], [0], [1], [0, 0, 1, 1], [], []>} : vector<8x4xf32>, vector<4x256xf32>, vector<8x256xf32> -> vector<8x256xf32>
    %53 = vector.broadcast %21 : vector<1x256xf32> to vector<8x256xf32>
    %54 = arith.mulf %52, %53 : vector<8x256xf32>
    %55 = arith.addf %48, %54 : vector<8x256xf32>
    %56 = vector.extract_strided_slice %30 {offsets = [0, 17], sizes = [4, 256], strides = [1, 1]} : vector<4x290xf32> to vector<4x256xf32>
    %c4 = arith.constant 4 : index
    %c0_23 = arith.constant 0 : index
    %c0_24 = arith.constant 0 : index
    %57 = vector.load %arg2[%c4, %c0_23, %c0_24] : memref<9x8x4xf32, #tpu.memory_space<vmem>>, vector<1x8x4xf32>
    %58 = vector.shape_cast %57 : vector<1x8x4xf32> to vector<8x4xf32>
    %cst_25 = arith.constant dense<0.000000e+00> : vector<8x256xf32>
    %59 = tpu.matmul %58, %56, %cst_25 {dimension_numbers = #tpu.dot_dimension_numbers<[1], [0], [0], [1], [0, 0, 1, 1], [], []>} : vector<8x4xf32>, vector<4x256xf32>, vector<8x256xf32> -> vector<8x256xf32>
    %60 = arith.addf %55, %59 : vector<8x256xf32>
    %61 = vector.extract_strided_slice %30 {offsets = [0, 18], sizes = [4, 256], strides = [1, 1]} : vector<4x290xf32> to vector<4x256xf32>
    %c5 = arith.constant 5 : index
    %c0_26 = arith.constant 0 : index
    %c0_27 = arith.constant 0 : index
    %62 = vector.load %arg2[%c5, %c0_26, %c0_27] : memref<9x8x4xf32, #tpu.memory_space<vmem>>, vector<1x8x4xf32>
    %63 = vector.shape_cast %62 : vector<1x8x4xf32> to vector<8x4xf32>
    %cst_28 = arith.constant dense<0.000000e+00> : vector<8x256xf32>
    %64 = tpu.matmul %63, %61, %cst_28 {dimension_numbers = #tpu.dot_dimension_numbers<[1], [0], [0], [1], [0, 0, 1, 1], [], []>} : vector<8x4xf32>, vector<4x256xf32>, vector<8x256xf32> -> vector<8x256xf32>
    %65 = vector.broadcast %26 : vector<1x256xf32> to vector<8x256xf32>
    %66 = arith.mulf %64, %65 : vector<8x256xf32>
    %67 = arith.addf %60, %66 : vector<8x256xf32>
    %68 = vector.extract_strided_slice %30 {offsets = [0, 32], sizes = [4, 256], strides = [1, 1]} : vector<4x290xf32> to vector<4x256xf32>
    %c6 = arith.constant 6 : index
    %c0_29 = arith.constant 0 : index
    %c0_30 = arith.constant 0 : index
    %69 = vector.load %arg2[%c6, %c0_29, %c0_30] : memref<9x8x4xf32, #tpu.memory_space<vmem>>, vector<1x8x4xf32>
    %70 = vector.shape_cast %69 : vector<1x8x4xf32> to vector<8x4xf32>
    %cst_31 = arith.constant dense<0.000000e+00> : vector<8x256xf32>
    %71 = tpu.matmul %70, %68, %cst_31 {dimension_numbers = #tpu.dot_dimension_numbers<[1], [0], [0], [1], [0, 0, 1, 1], [], []>} : vector<8x4xf32>, vector<4x256xf32>, vector<8x256xf32> -> vector<8x256xf32>
    %72 = vector.broadcast %21 : vector<1x256xf32> to vector<8x256xf32>
    %73 = arith.mulf %71, %72 : vector<8x256xf32>
    %74 = arith.addf %67, %73 : vector<8x256xf32>
    %75 = vector.extract_strided_slice %30 {offsets = [0, 33], sizes = [4, 256], strides = [1, 1]} : vector<4x290xf32> to vector<4x256xf32>
    %c7 = arith.constant 7 : index
    %c0_32 = arith.constant 0 : index
    %c0_33 = arith.constant 0 : index
    %76 = vector.load %arg2[%c7, %c0_32, %c0_33] : memref<9x8x4xf32, #tpu.memory_space<vmem>>, vector<1x8x4xf32>
    %77 = vector.shape_cast %76 : vector<1x8x4xf32> to vector<8x4xf32>
    %cst_34 = arith.constant dense<0.000000e+00> : vector<8x256xf32>
    %78 = tpu.matmul %77, %75, %cst_34 {dimension_numbers = #tpu.dot_dimension_numbers<[1], [0], [0], [1], [0, 0, 1, 1], [], []>} : vector<8x4xf32>, vector<4x256xf32>, vector<8x256xf32> -> vector<8x256xf32>
    %79 = arith.addf %74, %78 : vector<8x256xf32>
    %80 = vector.extract_strided_slice %30 {offsets = [0, 34], sizes = [4, 256], strides = [1, 1]} : vector<4x290xf32> to vector<4x256xf32>
    %c8 = arith.constant 8 : index
    %c0_35 = arith.constant 0 : index
    %c0_36 = arith.constant 0 : index
    %81 = vector.load %arg2[%c8, %c0_35, %c0_36] : memref<9x8x4xf32, #tpu.memory_space<vmem>>, vector<1x8x4xf32>
    %82 = vector.shape_cast %81 : vector<1x8x4xf32> to vector<8x4xf32>
    %cst_37 = arith.constant dense<0.000000e+00> : vector<8x256xf32>
    %83 = tpu.matmul %82, %80, %cst_37 {dimension_numbers = #tpu.dot_dimension_numbers<[1], [0], [0], [1], [0, 0, 1, 1], [], []>} : vector<8x4xf32>, vector<4x256xf32>, vector<8x256xf32> -> vector<8x256xf32>
    %84 = vector.broadcast %26 : vector<1x256xf32> to vector<8x256xf32>
    %85 = arith.mulf %83, %84 : vector<8x256xf32>
    %86 = arith.addf %79, %85 : vector<8x256xf32>
    %c0_38 = arith.constant 0 : index
    %c0_39 = arith.constant 0 : index
    %87 = vector.load %arg3[%c0_38, %c0_39] : memref<8x1xf32, #tpu.memory_space<vmem>>, vector<8x1xf32>
    %88 = vector.broadcast %87 : vector<8x1xf32> to vector<8x256xf32>
    %89 = arith.addf %86, %88 : vector<8x256xf32>
    %cst_40 = arith.constant 1.000000e+00 : f32
    %90 = vector.broadcast %cst_40 : f32 to vector<8x256xf32>
    %91 = arith.mulf %89, %90 : vector<8x256xf32>
    %92 = arith.negf %89 : vector<8x256xf32>
    %93 = math.exp %92 : vector<8x256xf32>
    %cst_41 = arith.constant 1.000000e+00 : f32
    %94 = vector.broadcast %cst_41 : f32 to vector<8x256xf32>
    %95 = arith.addf %94, %93 : vector<8x256xf32>
    %96 = arith.divf %94, %95 : vector<8x256xf32>
    %97 = arith.mulf %89, %96 : vector<8x256xf32>
    %98 = tpu.concatenate %91, %97 in 0 : vector<8x256xf32>, vector<8x256xf32> -> vector<16x256xf32>
    %cst_42 = arith.constant 0.000000e+00 : f32
    %99 = vector.broadcast %cst_42 : f32 to vector<16x17xf32>
    %100 = tpu.concatenate %99, %98, %99 in 1 : vector<16x17xf32>, vector<16x256xf32>, vector<16x17xf32> -> vector<16x290xf32>
    %101 = vector.extract_strided_slice %100 {offsets = [0, 0], sizes = [16, 256], strides = [1, 1]} : vector<16x290xf32> to vector<16x256xf32>
    %c0_43 = arith.constant 0 : index
    %c0_44 = arith.constant 0 : index
    %c0_45 = arith.constant 0 : index
    %102 = vector.load %arg4[%c0_43, %c0_44, %c0_45] : memref<9x8x16xf32, #tpu.memory_space<vmem>>, vector<1x8x16xf32>
    %103 = vector.shape_cast %102 : vector<1x8x16xf32> to vector<8x16xf32>
    %cst_46 = arith.constant dense<0.000000e+00> : vector<8x256xf32>
    %104 = tpu.matmul %103, %101, %cst_46 {dimension_numbers = #tpu.dot_dimension_numbers<[1], [0], [0], [1], [0, 0, 1, 1], [], []>} : vector<8x16xf32>, vector<16x256xf32>, vector<8x256xf32> -> vector<8x256xf32>
    %105 = vector.broadcast %21 : vector<1x256xf32> to vector<8x256xf32>
    %106 = arith.mulf %104, %105 : vector<8x256xf32>
    %107 = vector.extract_strided_slice %100 {offsets = [0, 1], sizes = [16, 256], strides = [1, 1]} : vector<16x290xf32> to vector<16x256xf32>
    %c1_47 = arith.constant 1 : index
    %c0_48 = arith.constant 0 : index
    %c0_49 = arith.constant 0 : index
    %108 = vector.load %arg4[%c1_47, %c0_48, %c0_49] : memref<9x8x16xf32, #tpu.memory_space<vmem>>, vector<1x8x16xf32>
    %109 = vector.shape_cast %108 : vector<1x8x16xf32> to vector<8x16xf32>
    %cst_50 = arith.constant dense<0.000000e+00> : vector<8x256xf32>
    %110 = tpu.matmul %109, %107, %cst_50 {dimension_numbers = #tpu.dot_dimension_numbers<[1], [0], [0], [1], [0, 0, 1, 1], [], []>} : vector<8x16xf32>, vector<16x256xf32>, vector<8x256xf32> -> vector<8x256xf32>
    %111 = arith.addf %106, %110 : vector<8x256xf32>
    %112 = vector.extract_strided_slice %100 {offsets = [0, 2], sizes = [16, 256], strides = [1, 1]} : vector<16x290xf32> to vector<16x256xf32>
    %c2_51 = arith.constant 2 : index
    %c0_52 = arith.constant 0 : index
    %c0_53 = arith.constant 0 : index
    %113 = vector.load %arg4[%c2_51, %c0_52, %c0_53] : memref<9x8x16xf32, #tpu.memory_space<vmem>>, vector<1x8x16xf32>
    %114 = vector.shape_cast %113 : vector<1x8x16xf32> to vector<8x16xf32>
    %cst_54 = arith.constant dense<0.000000e+00> : vector<8x256xf32>
    %115 = tpu.matmul %114, %112, %cst_54 {dimension_numbers = #tpu.dot_dimension_numbers<[1], [0], [0], [1], [0, 0, 1, 1], [], []>} : vector<8x16xf32>, vector<16x256xf32>, vector<8x256xf32> -> vector<8x256xf32>
    %116 = vector.broadcast %26 : vector<1x256xf32> to vector<8x256xf32>
    %117 = arith.mulf %115, %116 : vector<8x256xf32>
    %118 = arith.addf %111, %117 : vector<8x256xf32>
    %119 = vector.extract_strided_slice %100 {offsets = [0, 16], sizes = [16, 256], strides = [1, 1]} : vector<16x290xf32> to vector<16x256xf32>
    %c3_55 = arith.constant 3 : index
    %c0_56 = arith.constant 0 : index
    %c0_57 = arith.constant 0 : index
    %120 = vector.load %arg4[%c3_55, %c0_56, %c0_57] : memref<9x8x16xf32, #tpu.memory_space<vmem>>, vector<1x8x16xf32>
    %121 = vector.shape_cast %120 : vector<1x8x16xf32> to vector<8x16xf32>
    %cst_58 = arith.constant dense<0.000000e+00> : vector<8x256xf32>
    %122 = tpu.matmul %121, %119, %cst_58 {dimension_numbers = #tpu.dot_dimension_numbers<[1], [0], [0], [1], [0, 0, 1, 1], [], []>} : vector<8x16xf32>, vector<16x256xf32>, vector<8x256xf32> -> vector<8x256xf32>
    %123 = vector.broadcast %21 : vector<1x256xf32> to vector<8x256xf32>
    %124 = arith.mulf %122, %123 : vector<8x256xf32>
    %125 = arith.addf %118, %124 : vector<8x256xf32>
    %126 = vector.extract_strided_slice %100 {offsets = [0, 17], sizes = [16, 256], strides = [1, 1]} : vector<16x290xf32> to vector<16x256xf32>
    %c4_59 = arith.constant 4 : index
    %c0_60 = arith.constant 0 : index
    %c0_61 = arith.constant 0 : index
    %127 = vector.load %arg4[%c4_59, %c0_60, %c0_61] : memref<9x8x16xf32, #tpu.memory_space<vmem>>, vector<1x8x16xf32>
    %128 = vector.shape_cast %127 : vector<1x8x16xf32> to vector<8x16xf32>
    %cst_62 = arith.constant dense<0.000000e+00> : vector<8x256xf32>
    %129 = tpu.matmul %128, %126, %cst_62 {dimension_numbers = #tpu.dot_dimension_numbers<[1], [0], [0], [1], [0, 0, 1, 1], [], []>} : vector<8x16xf32>, vector<16x256xf32>, vector<8x256xf32> -> vector<8x256xf32>
    %130 = arith.addf %125, %129 : vector<8x256xf32>
    %131 = vector.extract_strided_slice %100 {offsets = [0, 18], sizes = [16, 256], strides = [1, 1]} : vector<16x290xf32> to vector<16x256xf32>
    %c5_63 = arith.constant 5 : index
    %c0_64 = arith.constant 0 : index
    %c0_65 = arith.constant 0 : index
    %132 = vector.load %arg4[%c5_63, %c0_64, %c0_65] : memref<9x8x16xf32, #tpu.memory_space<vmem>>, vector<1x8x16xf32>
    %133 = vector.shape_cast %132 : vector<1x8x16xf32> to vector<8x16xf32>
    %cst_66 = arith.constant dense<0.000000e+00> : vector<8x256xf32>
    %134 = tpu.matmul %133, %131, %cst_66 {dimension_numbers = #tpu.dot_dimension_numbers<[1], [0], [0], [1], [0, 0, 1, 1], [], []>} : vector<8x16xf32>, vector<16x256xf32>, vector<8x256xf32> -> vector<8x256xf32>
    %135 = vector.broadcast %26 : vector<1x256xf32> to vector<8x256xf32>
    %136 = arith.mulf %134, %135 : vector<8x256xf32>
    %137 = arith.addf %130, %136 : vector<8x256xf32>
    %138 = vector.extract_strided_slice %100 {offsets = [0, 32], sizes = [16, 256], strides = [1, 1]} : vector<16x290xf32> to vector<16x256xf32>
    %c6_67 = arith.constant 6 : index
    %c0_68 = arith.constant 0 : index
    %c0_69 = arith.constant 0 : index
    %139 = vector.load %arg4[%c6_67, %c0_68, %c0_69] : memref<9x8x16xf32, #tpu.memory_space<vmem>>, vector<1x8x16xf32>
    %140 = vector.shape_cast %139 : vector<1x8x16xf32> to vector<8x16xf32>
    %cst_70 = arith.constant dense<0.000000e+00> : vector<8x256xf32>
    %141 = tpu.matmul %140, %138, %cst_70 {dimension_numbers = #tpu.dot_dimension_numbers<[1], [0], [0], [1], [0, 0, 1, 1], [], []>} : vector<8x16xf32>, vector<16x256xf32>, vector<8x256xf32> -> vector<8x256xf32>
    %142 = vector.broadcast %21 : vector<1x256xf32> to vector<8x256xf32>
    %143 = arith.mulf %141, %142 : vector<8x256xf32>
    %144 = arith.addf %137, %143 : vector<8x256xf32>
    %145 = vector.extract_strided_slice %100 {offsets = [0, 33], sizes = [16, 256], strides = [1, 1]} : vector<16x290xf32> to vector<16x256xf32>
    %c7_71 = arith.constant 7 : index
    %c0_72 = arith.constant 0 : index
    %c0_73 = arith.constant 0 : index
    %146 = vector.load %arg4[%c7_71, %c0_72, %c0_73] : memref<9x8x16xf32, #tpu.memory_space<vmem>>, vector<1x8x16xf32>
    %147 = vector.shape_cast %146 : vector<1x8x16xf32> to vector<8x16xf32>
    %cst_74 = arith.constant dense<0.000000e+00> : vector<8x256xf32>
    %148 = tpu.matmul %147, %145, %cst_74 {dimension_numbers = #tpu.dot_dimension_numbers<[1], [0], [0], [1], [0, 0, 1, 1], [], []>} : vector<8x16xf32>, vector<16x256xf32>, vector<8x256xf32> -> vector<8x256xf32>
    %149 = arith.addf %144, %148 : vector<8x256xf32>
    %150 = vector.extract_strided_slice %100 {offsets = [0, 34], sizes = [16, 256], strides = [1, 1]} : vector<16x290xf32> to vector<16x256xf32>
    %c8_75 = arith.constant 8 : index
    %c0_76 = arith.constant 0 : index
    %c0_77 = arith.constant 0 : index
    %151 = vector.load %arg4[%c8_75, %c0_76, %c0_77] : memref<9x8x16xf32, #tpu.memory_space<vmem>>, vector<1x8x16xf32>
    %152 = vector.shape_cast %151 : vector<1x8x16xf32> to vector<8x16xf32>
    %cst_78 = arith.constant dense<0.000000e+00> : vector<8x256xf32>
    %153 = tpu.matmul %152, %150, %cst_78 {dimension_numbers = #tpu.dot_dimension_numbers<[1], [0], [0], [1], [0, 0, 1, 1], [], []>} : vector<8x16xf32>, vector<16x256xf32>, vector<8x256xf32> -> vector<8x256xf32>
    %154 = vector.broadcast %26 : vector<1x256xf32> to vector<8x256xf32>
    %155 = arith.mulf %153, %154 : vector<8x256xf32>
    %156 = arith.addf %149, %155 : vector<8x256xf32>
    %c0_79 = arith.constant 0 : index
    %c0_80 = arith.constant 0 : index
    %157 = vector.load %arg5[%c0_79, %c0_80] : memref<8x1xf32, #tpu.memory_space<vmem>>, vector<8x1xf32>
    %158 = vector.broadcast %157 : vector<8x1xf32> to vector<8x256xf32>
    %159 = arith.addf %156, %158 : vector<8x256xf32>
    %160 = arith.addf %89, %159 : vector<8x256xf32>
    %cst_81 = arith.constant 5.000000e-01 : f32
    %161 = vector.broadcast %cst_81 : f32 to vector<8x256xf32>
    %162 = arith.mulf %160, %161 : vector<8x256xf32>
    %163 = arith.negf %159 : vector<8x256xf32>
    %164 = math.exp %163 : vector<8x256xf32>
    %cst_82 = arith.constant 1.000000e+00 : f32
    %165 = vector.broadcast %cst_82 : f32 to vector<8x256xf32>
    %166 = arith.addf %165, %164 : vector<8x256xf32>
    %167 = arith.divf %165, %166 : vector<8x256xf32>
    %168 = arith.mulf %159, %167 : vector<8x256xf32>
    %169 = tpu.concatenate %162, %168 in 0 : vector<8x256xf32>, vector<8x256xf32> -> vector<16x256xf32>
    %cst_83 = arith.constant 0.000000e+00 : f32
    %170 = vector.broadcast %cst_83 : f32 to vector<16x17xf32>
    %171 = tpu.concatenate %170, %169, %170 in 1 : vector<16x17xf32>, vector<16x256xf32>, vector<16x17xf32> -> vector<16x290xf32>
    %172 = vector.extract_strided_slice %171 {offsets = [0, 0], sizes = [16, 256], strides = [1, 1]} : vector<16x290xf32> to vector<16x256xf32>
    %c0_84 = arith.constant 0 : index
    %c0_85 = arith.constant 0 : index
    %c0_86 = arith.constant 0 : index
    %173 = vector.load %arg6[%c0_84, %c0_85, %c0_86] : memref<9x8x16xf32, #tpu.memory_space<vmem>>, vector<1x8x16xf32>
    %174 = vector.shape_cast %173 : vector<1x8x16xf32> to vector<8x16xf32>
    %cst_87 = arith.constant dense<0.000000e+00> : vector<8x256xf32>
    %175 = tpu.matmul %174, %172, %cst_87 {dimension_numbers = #tpu.dot_dimension_numbers<[1], [0], [0], [1], [0, 0, 1, 1], [], []>} : vector<8x16xf32>, vector<16x256xf32>, vector<8x256xf32> -> vector<8x256xf32>
    %176 = vector.broadcast %21 : vector<1x256xf32> to vector<8x256xf32>
    %177 = arith.mulf %175, %176 : vector<8x256xf32>
    %178 = vector.extract_strided_slice %171 {offsets = [0, 1], sizes = [16, 256], strides = [1, 1]} : vector<16x290xf32> to vector<16x256xf32>
    %c1_88 = arith.constant 1 : index
    %c0_89 = arith.constant 0 : index
    %c0_90 = arith.constant 0 : index
    %179 = vector.load %arg6[%c1_88, %c0_89, %c0_90] : memref<9x8x16xf32, #tpu.memory_space<vmem>>, vector<1x8x16xf32>
    %180 = vector.shape_cast %179 : vector<1x8x16xf32> to vector<8x16xf32>
    %cst_91 = arith.constant dense<0.000000e+00> : vector<8x256xf32>
    %181 = tpu.matmul %180, %178, %cst_91 {dimension_numbers = #tpu.dot_dimension_numbers<[1], [0], [0], [1], [0, 0, 1, 1], [], []>} : vector<8x16xf32>, vector<16x256xf32>, vector<8x256xf32> -> vector<8x256xf32>
    %182 = arith.addf %177, %181 : vector<8x256xf32>
    %183 = vector.extract_strided_slice %171 {offsets = [0, 2], sizes = [16, 256], strides = [1, 1]} : vector<16x290xf32> to vector<16x256xf32>
    %c2_92 = arith.constant 2 : index
    %c0_93 = arith.constant 0 : index
    %c0_94 = arith.constant 0 : index
    %184 = vector.load %arg6[%c2_92, %c0_93, %c0_94] : memref<9x8x16xf32, #tpu.memory_space<vmem>>, vector<1x8x16xf32>
    %185 = vector.shape_cast %184 : vector<1x8x16xf32> to vector<8x16xf32>
    %cst_95 = arith.constant dense<0.000000e+00> : vector<8x256xf32>
    %186 = tpu.matmul %185, %183, %cst_95 {dimension_numbers = #tpu.dot_dimension_numbers<[1], [0], [0], [1], [0, 0, 1, 1], [], []>} : vector<8x16xf32>, vector<16x256xf32>, vector<8x256xf32> -> vector<8x256xf32>
    %187 = vector.broadcast %26 : vector<1x256xf32> to vector<8x256xf32>
    %188 = arith.mulf %186, %187 : vector<8x256xf32>
    %189 = arith.addf %182, %188 : vector<8x256xf32>
    %190 = vector.extract_strided_slice %171 {offsets = [0, 16], sizes = [16, 256], strides = [1, 1]} : vector<16x290xf32> to vector<16x256xf32>
    %c3_96 = arith.constant 3 : index
    %c0_97 = arith.constant 0 : index
    %c0_98 = arith.constant 0 : index
    %191 = vector.load %arg6[%c3_96, %c0_97, %c0_98] : memref<9x8x16xf32, #tpu.memory_space<vmem>>, vector<1x8x16xf32>
    %192 = vector.shape_cast %191 : vector<1x8x16xf32> to vector<8x16xf32>
    %cst_99 = arith.constant dense<0.000000e+00> : vector<8x256xf32>
    %193 = tpu.matmul %192, %190, %cst_99 {dimension_numbers = #tpu.dot_dimension_numbers<[1], [0], [0], [1], [0, 0, 1, 1], [], []>} : vector<8x16xf32>, vector<16x256xf32>, vector<8x256xf32> -> vector<8x256xf32>
    %194 = vector.broadcast %21 : vector<1x256xf32> to vector<8x256xf32>
    %195 = arith.mulf %193, %194 : vector<8x256xf32>
    %196 = arith.addf %189, %195 : vector<8x256xf32>
    %197 = vector.extract_strided_slice %171 {offsets = [0, 17], sizes = [16, 256], strides = [1, 1]} : vector<16x290xf32> to vector<16x256xf32>
    %c4_100 = arith.constant 4 : index
    %c0_101 = arith.constant 0 : index
    %c0_102 = arith.constant 0 : index
    %198 = vector.load %arg6[%c4_100, %c0_101, %c0_102] : memref<9x8x16xf32, #tpu.memory_space<vmem>>, vector<1x8x16xf32>
    %199 = vector.shape_cast %198 : vector<1x8x16xf32> to vector<8x16xf32>
    %cst_103 = arith.constant dense<0.000000e+00> : vector<8x256xf32>
    %200 = tpu.matmul %199, %197, %cst_103 {dimension_numbers = #tpu.dot_dimension_numbers<[1], [0], [0], [1], [0, 0, 1, 1], [], []>} : vector<8x16xf32>, vector<16x256xf32>, vector<8x256xf32> -> vector<8x256xf32>
    %201 = arith.addf %196, %200 : vector<8x256xf32>
    %202 = vector.extract_strided_slice %171 {offsets = [0, 18], sizes = [16, 256], strides = [1, 1]} : vector<16x290xf32> to vector<16x256xf32>
    %c5_104 = arith.constant 5 : index
    %c0_105 = arith.constant 0 : index
    %c0_106 = arith.constant 0 : index
    %203 = vector.load %arg6[%c5_104, %c0_105, %c0_106] : memref<9x8x16xf32, #tpu.memory_space<vmem>>, vector<1x8x16xf32>
    %204 = vector.shape_cast %203 : vector<1x8x16xf32> to vector<8x16xf32>
    %cst_107 = arith.constant dense<0.000000e+00> : vector<8x256xf32>
    %205 = tpu.matmul %204, %202, %cst_107 {dimension_numbers = #tpu.dot_dimension_numbers<[1], [0], [0], [1], [0, 0, 1, 1], [], []>} : vector<8x16xf32>, vector<16x256xf32>, vector<8x256xf32> -> vector<8x256xf32>
    %206 = vector.broadcast %26 : vector<1x256xf32> to vector<8x256xf32>
    %207 = arith.mulf %205, %206 : vector<8x256xf32>
    %208 = arith.addf %201, %207 : vector<8x256xf32>
    %209 = vector.extract_strided_slice %171 {offsets = [0, 32], sizes = [16, 256], strides = [1, 1]} : vector<16x290xf32> to vector<16x256xf32>
    %c6_108 = arith.constant 6 : index
    %c0_109 = arith.constant 0 : index
    %c0_110 = arith.constant 0 : index
    %210 = vector.load %arg6[%c6_108, %c0_109, %c0_110] : memref<9x8x16xf32, #tpu.memory_space<vmem>>, vector<1x8x16xf32>
    %211 = vector.shape_cast %210 : vector<1x8x16xf32> to vector<8x16xf32>
    %cst_111 = arith.constant dense<0.000000e+00> : vector<8x256xf32>
    %212 = tpu.matmul %211, %209, %cst_111 {dimension_numbers = #tpu.dot_dimension_numbers<[1], [0], [0], [1], [0, 0, 1, 1], [], []>} : vector<8x16xf32>, vector<16x256xf32>, vector<8x256xf32> -> vector<8x256xf32>
    %213 = vector.broadcast %21 : vector<1x256xf32> to vector<8x256xf32>
    %214 = arith.mulf %212, %213 : vector<8x256xf32>
    %215 = arith.addf %208, %214 : vector<8x256xf32>
    %216 = vector.extract_strided_slice %171 {offsets = [0, 33], sizes = [16, 256], strides = [1, 1]} : vector<16x290xf32> to vector<16x256xf32>
    %c7_112 = arith.constant 7 : index
    %c0_113 = arith.constant 0 : index
    %c0_114 = arith.constant 0 : index
    %217 = vector.load %arg6[%c7_112, %c0_113, %c0_114] : memref<9x8x16xf32, #tpu.memory_space<vmem>>, vector<1x8x16xf32>
    %218 = vector.shape_cast %217 : vector<1x8x16xf32> to vector<8x16xf32>
    %cst_115 = arith.constant dense<0.000000e+00> : vector<8x256xf32>
    %219 = tpu.matmul %218, %216, %cst_115 {dimension_numbers = #tpu.dot_dimension_numbers<[1], [0], [0], [1], [0, 0, 1, 1], [], []>} : vector<8x16xf32>, vector<16x256xf32>, vector<8x256xf32> -> vector<8x256xf32>
    %220 = arith.addf %215, %219 : vector<8x256xf32>
    %221 = vector.extract_strided_slice %171 {offsets = [0, 34], sizes = [16, 256], strides = [1, 1]} : vector<16x290xf32> to vector<16x256xf32>
    %c8_116 = arith.constant 8 : index
    %c0_117 = arith.constant 0 : index
    %c0_118 = arith.constant 0 : index
    %222 = vector.load %arg6[%c8_116, %c0_117, %c0_118] : memref<9x8x16xf32, #tpu.memory_space<vmem>>, vector<1x8x16xf32>
    %223 = vector.shape_cast %222 : vector<1x8x16xf32> to vector<8x16xf32>
    %cst_119 = arith.constant dense<0.000000e+00> : vector<8x256xf32>
    %224 = tpu.matmul %223, %221, %cst_119 {dimension_numbers = #tpu.dot_dimension_numbers<[1], [0], [0], [1], [0, 0, 1, 1], [], []>} : vector<8x16xf32>, vector<16x256xf32>, vector<8x256xf32> -> vector<8x256xf32>
    %225 = vector.broadcast %26 : vector<1x256xf32> to vector<8x256xf32>
    %226 = arith.mulf %224, %225 : vector<8x256xf32>
    %227 = arith.addf %220, %226 : vector<8x256xf32>
    %c0_120 = arith.constant 0 : index
    %c0_121 = arith.constant 0 : index
    %228 = vector.load %arg7[%c0_120, %c0_121] : memref<8x1xf32, #tpu.memory_space<vmem>>, vector<8x1xf32>
    %229 = vector.broadcast %228 : vector<8x1xf32> to vector<8x256xf32>
    %230 = arith.addf %227, %229 : vector<8x256xf32>
    %c0_122 = arith.constant 0 : index
    %c0_123 = arith.constant 0 : index
    %c0_124 = arith.constant 0 : index
    %231 = vector.load %arg8[%c0_122, %c0_123, %c0_124] : memref<1x8x256xf32, #tpu.memory_space<vmem>>, vector<1x8x256xf32>
    %232 = vector.shape_cast %231 : vector<1x8x256xf32> to vector<8x256xf32>
    %233 = vector.shape_cast %230 : vector<8x256xf32> to vector<1x8x256xf32>
    tpu.vector_store %arg8[%c0_122, %c0_123, %c0_124], %233 {strides = array<i32>} : memref<1x8x256xf32, #tpu.memory_space<vmem>>, vector<1x8x256xf32>,
    return
  }
  func.func @transform_0(%arg0: i32) -> (i32, i32, i32) {
    %c0_i32 = arith.constant 0 : i32
    %c0_i32_0 = arith.constant 0 : i32
    %c0_i32_1 = arith.constant 0 : i32
    return %arg0, %c0_i32, %c0_i32_0 : i32, i32, i32
  }
  func.func @transform_1(%arg0: i32) -> (i32, i32, i32) {
    %c0_i32 = arith.constant 0 : i32
    %c0_i32_0 = arith.constant 0 : i32
    %c0_i32_1 = arith.constant 0 : i32
    %c0_i32_2 = arith.constant 0 : i32
    return %c0_i32, %c0_i32_0, %c0_i32_1 : i32, i32, i32
  }
  func.func @transform_2(%arg0: i32) -> (i32, i32) {
    %c0_i32 = arith.constant 0 : i32
    %c0_i32_0 = arith.constant 0 : i32
    %c0_i32_1 = arith.constant 0 : i32
    return %c0_i32, %c0_i32_0 : i32, i32
  }
  func.func @transform_3(%arg0: i32) -> (i32, i32, i32) {
    %c0_i32 = arith.constant 0 : i32
    %c0_i32_0 = arith.constant 0 : i32
    %c0_i32_1 = arith.constant 0 : i32
    %c0_i32_2 = arith.constant 0 : i32
    return %c0_i32, %c0_i32_0, %c0_i32_1 : i32, i32, i32
  }
  func.func @transform_4(%arg0: i32) -> (i32, i32) {
    %c0_i32 = arith.constant 0 : i32
    %c0_i32_0 = arith.constant 0 : i32
    %c0_i32_1 = arith.constant 0 : i32
    return %c0_i32, %c0_i32_0 : i32, i32
  }
  func.func @transform_5(%arg0: i32) -> (i32, i32, i32) {
    %c0_i32 = arith.constant 0 : i32
    %c0_i32_0 = arith.constant 0 : i32
    %c0_i32_1 = arith.constant 0 : i32
    %c0_i32_2 = arith.constant 0 : i32
    return %c0_i32, %c0_i32_0, %c0_i32_1 : i32, i32, i32
  }
  func.func @transform_6(%arg0: i32) -> (i32, i32) {
    %c0_i32 = arith.constant 0 : i32
    %c0_i32_0 = arith.constant 0 : i32
    %c0_i32_1 = arith.constant 0 : i32
    return %c0_i32, %c0_i32_0 : i32, i32
  }
  func.func @transform_7(%arg0: i32) -> (i32, i32, i32) {
    %c0_i32 = arith.constant 0 : i32
    %c0_i32_0 = arith.constant 0 : i32
    %c0_i32_1 = arith.constant 0 : i32
    return %arg0, %c0_i32, %c0_i32_0 : i32, i32, i32
  }
}

</mosaic_0001>

<bundles_post_ra>
// kernel: tpu_custom_call.1
= control target key start
LH: loop header
LB: loop body
LE: loop exit
PB: predicated region body
PF: predicated region fallthrough
CT: control target
= control target key end

     0   :  { %12 = vsyncpa [#allocation3], 0  ;;  %s4070_s0 = inlined_call_operand.vmem [shape: f32[2,4,256], index: 0, kind: input, shape index: {}]   ;;  %s4071_s1 = inlined_call_operand.vmem [shape: f32[9,8,4], index: 1, kind: input, shape index: {}]   ;;  %s4072_s2 = inlined_call_operand.vmem [shape: f32[8,1], index: 2, kind: input, shape index: {}]   ;;  %s4073_s3 = inlined_call_operand.vmem [shape: f32[9,8,16], index: 3, kind: input, shape index: {}]   ;;  %s4074_s4 = inlined_call_operand.vmem [shape: f32[8,1], index: 4, kind: input, shape index: {}]   ;;  %s4075_s5 = inlined_call_operand.hbm [shape: f32[9,8,16], index: 5, kind: input, shape index: {}]   ;;  %s4076_s6 = inlined_call_operand.vmem [shape: f32[8,1], index: 6, kind: input, shape index: {}]   ;;  %s4077_s7 = inlined_call_operand.hbm [shape: f32[2,8,256], index: 7, kind: output, shape index: {}]  }
   0x1   :  { %13 = vsyncpa [#allocation4], 0 }
   0x2   :  { %15 = vsyncpa [#allocation4 + $0x1], 0  ;;  %s3424_s24 = smov 0   ;;  %s3426_s25 = smov 0  }
   0x3   :  { %s3428_s26 = smov 0   ;;  %s3430_s27 = smov 0  }
   0x4 LB: > { %s3445_s28 = sadd.s32 4294967295, %s3367_s27   ;;  %s3106_s29 = sadd.s32 4294967294, %s3367_s27   ;;  %s3367_s27 = sphi %s3430_s27, %s4087_s27   ;;  %s3363_s26 = sphi %s3428_s26, %s4086_s26   ;;  %s3359_s25 = sphi %s3426_s25, %s4085_s25   ;;  %s3355_s24 = sphi %s3424_s24, %s4084_s24  }
   0x5   : > { %s3449_s30 = sadd.s32 1, %s3367_s27   ;;  %s180_s8 = sadd.s32 1, %s3363_s26 }
   0x6   : > { %s177_s9 = ssub.s32 %s3367_s27, %s3449_s30  ;;  %p190_p0 = scmp.ne.s32.totalorder %s3363_s26, %s3359_s25 }
   0x7   : > { %p178_p1 = scmp.eq.s32.totalorder %s177_s9, 0  ;;  %p191_p2 = scmp.eq.s32.totalorder %s3445_s28, 1 }
   0x8   : > { %p196_p3 = scmp.ne.s32.totalorder %s3359_s25, %s3355_s24  ;;  %p197_p4 = scmp.eq.s32.totalorder %s3106_s29, 1 }
   0x9   : > { %s3460_s10 = scalar_select %p178_p1, %s3363_s26, %s180_s8  }
   0xa   : > { %p3462_p5 = por %p191_p2, %p190_p0  ;;  %p3466_p6 = por %p197_p4, %p196_p3 }
   0xb   : > { %p3107_p7 = scmp.ge.s32.totalorder %s3367_s27, 1  ;;  %p204_p8 = scmp.lt.s32.totalorder %s3367_s27, 3 }
   0xc   : > { %s4079_s12 = scalar_select %p3466_p6, 1, 0 }
   0xd   : > { %p3209_p9 = scmp.eq.s32.totalorder %s3445_s28, 0  ;;  %p3473_p10 = pnand %p3107_p7, %p204_p8 }
   0xe   : > { %s3369_s14 = smov [#allocation2]  }
   0xf   : > { %s228_s15 = sshll.u32 %s3369_s14, 4  ;;  %p3201_p11 = pneg %p3473_p10  ;;  %s229_s15 = int_to_ptr.vmem [resolvable:$true] %s228_s15 }
  0x10   : > { %s3288_s16 = scalar_lea.vmem %s229_s15, 1152  ;;  %p3296_p3 = scmp.lt.s32.totalorder %s229_s15, %s229_s15 }
  0x11   : > { %p3202_p12 = pnand %p3209_p9, %p3201_p11  ;;  %p3289_p0 = scmp.ne.s32.totalorder %s229_s15, %s3288_s16 }
  0x12   : > { %p3297_p4 = scmp.lt.s32.totalorder %s3288_s16, %s3288_s16 }
  0x13   : > { %p3279_p13 = pneg %p3202_p12 }
  0x14   : > { %p3298_p6 = por %p3297_p4, %p3296_p3 }
  0x15   : > { %p3291_p1 = pnand %p3289_p0, %p3279_p13 }
  0x17   : > { %p3292_p2 = pneg %p3291_p1 }
  0x19   : > { %p3299_p7 = pnand %p3298_p6, %p3292_p2 }
  0x1b   : > { %3302 = shalt.err (!%p3299_p7)
}
  0x1c   : > { %s3370_s17 = smov 128   ;;  %s3371_s18 = smov 8  }
  0x1d   : > { %3204 = dma.hbm_to_vmem [thread:$0]  (!%p3202_p12), %s4075_s5, 1152, %s229_s15, [#allocation3], %s3370_s17, %s3370_s17, %s3371_s18  }
  0x1e   : > { %255 = sbr.rel (%p3473_p10) target bundleno = 1594 (0x63a), region = 48 }
  0x23   : > { %3346 = dma.done.wait (%p3209_p9), [#allocation3], 1152  }
  0x24   : > { %3348 = vsyncadd (%p3209_p9), [#allocation3], 4294966144  ;;  %p287_p8 = scmp.lt.s32.totalorder %s3445_s28, 1  ;;  %s3372_s9 = smov 17   ;;  %vm334_vm0 = vcmask 138240   ;;  %vm345_vm1 = vcmask 1043456   ;;  %v292_v59 = vlaneseq }
  0x25   : > { %s3373_s13 = smov 126   ;;  %s3374_s14 = smov 127   ;;  %v340_v6 = vld [vmem:[%s4071_s1] sm:$0xff]  ;;  %vm341_vm2 = vcmask 31744   ;;  %v3379_v8 = vmov 0.0   ;;  %v3382_v9 = vmov 0   ;;  %vm3678_vm15 = vmneg %vm334_vm0 }
  0x26   : > { %s288_s21 = scalar_select %p287_p8, %s3445_s28, 1  ;;  %415 = vmatprep.mubr.f32.mxu0 %v3379_v8  ;;  %507 = vmatprep.mubr.f32.mxu1 %v3379_v8  ;;  %v1163_v10 = vld [vmem:[%s4072_s2] sm:$0xff]  ;;  %vm433_vm3 = vcmask 1039360   ;;  %v3118_v22 = vld [vmem:[%s4071_s1 + $0x8] sm:$0xff]  ;;  %vm524_vm4 = vcmask 1031168   ;;  %v3122_v28 = vld [vmem:[%s4071_s1 + $0x10] sm:$0xff] }
  0x27   : > { %s3375_s15 = smov 111   ;;  %s3376_s16 = smov 112   ;;  %3258 = vset.pattern.permute.xlu0 %v3382_v9  ;;  %3259 = vset.pattern.permute.xlu1 %v3382_v9  ;;  %vm617_vm5 = vcmask 916480   ;;  %v3126_v32 = vld [vmem:[%s4071_s1 + $0x18] sm:$0xff]  ;;  %vm710_vm6 = vcmask 908288   ;;  %v3130_v38 = vld [vmem:[%s4071_s1 + $0x20] sm:$0xff] }
  0x28   : > { %s3193_s22 = sshll.u32 %s288_s21, 3  ;;  %s3377_s17 = smov 96   ;;  %vm801_vm7 = vcmask 900096   ;;  %v3134_v42 = vld [vmem:[%s4071_s1 + $0x28] sm:$0xff]  ;;  %vm894_vm8 = vcmask 785408   ;;  %v3138_v48 = vld [vmem:[%s4071_s1 + $0x30] sm:$0xff] }
  0x29   : > { %s291_s8 = scalar_lea.vmem %s4070_s0, %s3193_s22  ;;  %s3378_s18 = smov 110   ;;  %vm987_vm9 = vcmask 777216   ;;  %v3142_v53 = vld [vmem:[%s4071_s1 + $0x38] sm:$0xff]  ;;  %vm1078_vm10 = vcmask 769024   ;;  %v3146_v57 = vld [vmem:[%s4071_s1 + $0x40] sm:$0xff]  ;;  %v293_v60 = vand.u32 127, %v292_v59 }
  0x2a   : > { %v327_v0 = vld [vmem:[%s291_s8] sm:$0xff]  ;;  %s3380_s21 = smov 95   ;;  %s3381_s22 = smov 94  }
  0x2b   : > { %330 = vrot.lane.b32.xlu0 %v327_v0, %s3372_s9  ;;  %v329_v1 = vcombine.high %v327_v0, %v327_v0  ;;  %v294_v61 = vadd.s32 128, %v293_v60  ;;  %v299_v62 = vand.u32 15, %v293_v60  ;;  %s3383_s29 = smov [#allocation5]  }
  0x2d   : > { %v306_v0 = vand.u32 15, %v294_v61  ;;  %vm319_vm11 = vcmp.ge.s32.totalorder %v299_v62, 1  ;;  %vm323_vm13 = vcmp.le.s32.totalorder %v299_v62, 14 }
  0x2e   : > { %v3616_v9 = vsel %vm323_vm13, 1.0, %v3379_v8 }
  0x2f   : > { %332 = vrot.lane.b32.xlu0 %v329_v1, %s3372_s9  ;;  %vm320_vm12 = vcmp.ge.s32.totalorder %v306_v0, 1  ;;  %vm324_vm14 = vcmp.le.s32.totalorder %v306_v0, 14 }
  0x9d   : > { %v331_v2 = vpop.permute.xlu0 %330 }
  0x9e   : > { %v338_v3 = vsel %vm334_vm0, 0.0, %v331_v2 }
  0x9f   : > { %518 = vrot.lane.b32.xlu1 %v338_v3, %s3373_s13  ;;  %427 = vrot.lane.b32.xlu0 %v338_v3, %s3374_s14 }
  0xa1   : > { %v333_v4 = vpop.permute.xlu0 %332 }
  0xa2   : > { %v335_v5 = vsel %vm334_vm0, %v331_v2, %v333_v4  ;;  %v339_v7 = vsel %vm334_vm0, %v333_v4, 0.0  ;;  %v3612_v4 = vsel %vm320_vm12, 1.0, %v3379_v8 }
  0xa3   : > { %704 = vrot.lane.b32.xlu1 %v338_v3, %s3375_s15  ;;  %611 = vrot.lane.b32.xlu0 %v338_v3, %s3376_s16 }
  0xa4   : > { %3115 = vmatprep.subr.msk.mxu0 %vm345_vm1, %v335_v5 }
  0xa5   : > { %3116 = vmatpush1.msk.msra.mxu0 %vm345_vm1, %v338_v3 }
  0xa6   : > { %3117 = vmatmul.mubr.msk.f32.vlgmr.msra.gmra.mxu0 %vm341_vm2, %v340_v6 }
  0xa7   : > { %888 = vrot.lane.b32.xlu1 %v338_v3, %s3377_s17  ;;  %795 = vrot.lane.b32.xlu0 %v338_v3, %s3378_s18 }
  0xa8   : > { %598 = vmatprep.mubr.f32.mxu0 %v3379_v8 }
  0xab   : > { %522 = vrot.lane.b32.xlu0 %v339_v7, %s3373_s13  ;;  %429 = vrot.lane.b32.xlu1 %v335_v5, %s3374_s14 }
  0xaf   : > { %613 = vrot.lane.b32.xlu0 %v335_v5, %s3376_s16  ;;  %431 = vrot.lane.b32.xlu1 %v339_v7, %s3374_s14 }
  0xb3   : > { %708 = vrot.lane.b32.xlu0 %v339_v7, %s3375_s15  ;;  %520 = vrot.lane.b32.xlu1 %v335_v5, %s3373_s13 }
  0xb7   : > { %797 = vrot.lane.b32.xlu0 %v335_v5, %s3378_s18  ;;  %615 = vrot.lane.b32.xlu1 %v339_v7, %s3376_s16 }
  0xbb   : > { %892 = vrot.lane.b32.xlu0 %v339_v7, %s3377_s17  ;;  %706 = vrot.lane.b32.xlu1 %v335_v5, %s3375_s15 }
  0xbf   : > { %983 = vrot.lane.b32.xlu0 %v335_v5, %s3380_s21  ;;  %799 = vrot.lane.b32.xlu1 %v339_v7, %s3378_s18 }
  0xc3   : > { %1074 = vrot.lane.b32.xlu0 %v335_v5, %s3381_s22  ;;  %890 = vrot.lane.b32.xlu1 %v335_v5, %s3377_s17 }
  0xc7   : > { %981 = vrot.lane.b32.xlu0 %v338_v3, %s3380_s21  ;;  %985 = vrot.lane.b32.xlu1 %v339_v7, %s3380_s21 }
  0xcb   : > { %1076 = vrot.lane.b32.xlu1 %v339_v7, %s3381_s22  ;;  %1166 = vperm.xlu0 %3258, %v1163_v10  }
  0xcf   : > { %1072 = vrot.lane.b32.xlu1 %v338_v3, %s3381_s22  ;;  %v3609_v3 = vsel %vm319_vm11, 1.0, %v3379_v8 }
 0x111   : > { %v519_v11 = vpop.permute.xlu1 %518  ;;  %v428_v12 = vpop.permute.xlu0 %427 }
 0x115   : > { %v705_v13 = vpop.permute.xlu1 %704  ;;  %v612_v14 = vpop.permute.xlu0 %611 }
 0x119   : > { %v889_v15 = vpop.permute.xlu1 %888  ;;  %v796_v16 = vpop.permute.xlu0 %795 }
 0x11d   : > { %v430_v17 = vpop.permute.xlu1 %429  ;;  %v523_v18 = vpop.permute.xlu0 %522 }
 0x11e   : > { %v434_v23 = vsel %vm433_vm3, %v428_v12, %v430_v17 }
 0x121   : > { %v432_v19 = vpop.permute.xlu1 %431  ;;  %v614_v20 = vpop.permute.xlu0 %613 }
 0x122   : > { %v435_v21 = vsel %vm433_vm3, %v430_v17, %v432_v19  ;;  %v618_v33 = vsel %vm617_vm5, %v612_v14, %v614_v20 }
 0x123   : > { %3119 = vmatprep.subr.msk.mxu1 %vm345_vm1, %v435_v21 }
 0x124   : > { %3120 = vmatpush1.msk.msra.mxu1 %vm345_vm1, %v434_v23 }
 0x125   : > { %v521_v24 = vpop.permute.xlu1 %520  ;;  %v709_v25 = vpop.permute.xlu0 %708  ;;  %3121 = vmatmul.mubr.msk.f32.vlgmr.msra.gmra.mxu1 %vm341_vm2, %v3118_v22 }
 0x126   : > { %v525_v26 = vsel %vm524_vm4, %v519_v11, %v521_v24  ;;  %v526_v27 = vsel %vm524_vm4, %v521_v24, %v523_v18  ;;  %691 = vmatprep.mubr.f32.mxu1 %v3379_v8  ;;  %v3620_v11 = vsel %vm324_vm14, 1.0, %v3379_v8 }
 0x127   : > { %3123 = vmatprep.subr.msk.mxu0 %vm345_vm1, %v526_v27 }
 0x128   : > { %3124 = vmatpush1.msk.msra.mxu0 %vm345_vm1, %v525_v26 }
 0x129   : > { %v616_v29 = vpop.permute.xlu1 %615  ;;  %v798_v30 = vpop.permute.xlu0 %797  ;;  %3125 = vmatmul.mubr.msk.f32.vlgmr.msra.gmra.mxu0 %vm341_vm2, %v3122_v28 }
 0x12a   : > { %v619_v31 = vsel %vm617_vm5, %v614_v20, %v616_v29  ;;  %784 = vmatprep.mubr.f32.mxu0 %v3379_v8  ;;  %v802_v43 = vsel %vm801_vm7, %v796_v16, %v798_v30 }
 0x12b   : > { %3127 = vmatprep.subr.msk.mxu1 %vm345_vm1, %v619_v31 }
 0x12c   : > { %3128 = vmatpush1.msk.msra.mxu1 %vm345_vm1, %v618_v33 }
 0x12d   : > { %v707_v34 = vpop.permute.xlu1 %706  ;;  %v893_v35 = vpop.permute.xlu0 %892  ;;  %3129 = vmatmul.mubr.msk.f32.vlgmr.msra.gmra.mxu1 %vm341_vm2, %v3126_v32 }
 0x12e   : > { %v711_v36 = vsel %vm710_vm6, %v705_v13, %v707_v34  ;;  %v712_v37 = vsel %vm710_vm6, %v707_v34, %v709_v25  ;;  %875 = vmatprep.mubr.f32.mxu1 %v3379_v8 }
 0x12f   : > { %3131 = vmatprep.subr.msk.mxu0 %vm345_vm1, %v712_v37 }
 0x130   : > { %3132 = vmatpush1.msk.msra.mxu0 %vm345_vm1, %v711_v36 }
 0x131   : > { %v800_v39 = vpop.permute.xlu1 %799  ;;  %v984_v40 = vpop.permute.xlu0 %983  ;;  %3133 = vmatmul.mubr.msk.f32.vlgmr.msra.gmra.mxu0 %vm341_vm2, %v3130_v38 }
 0x132   : > { %v803_v41 = vsel %vm801_vm7, %v798_v30, %v800_v39  ;;  %968 = vmatprep.mubr.f32.mxu0 %v3379_v8 }
 0x133   : > { %3135 = vmatprep.subr.msk.mxu1 %vm345_vm1, %v803_v41 }
 0x134   : > { %3136 = vmatpush1.msk.msra.mxu1 %vm345_vm1, %v802_v43 }
 0x135   : > { %v891_v44 = vpop.permute.xlu1 %890  ;;  %v1075_v45 = vpop.permute.xlu0 %1074  ;;  %3137 = vmatmul.mubr.msk.f32.vlgmr.msra.gmra.mxu1 %vm341_vm2, %v3134_v42 }
 0x136   : > { %v895_v46 = vsel %vm894_vm8, %v889_v15, %v891_v44  ;;  %v896_v47 = vsel %vm894_vm8, %v891_v44, %v893_v35  ;;  %1061 = vmatprep.mubr.f32.mxu1 %v3379_v8 }
 0x137   : > { %3139 = vmatprep.subr.msk.mxu0 %vm345_vm1, %v896_v47 }
 0x138   : > { %3140 = vmatpush1.msk.msra.mxu0 %vm345_vm1, %v895_v46 }
 0x139   : > { %v986_v49 = vpop.permute.xlu1 %985  ;;  %v982_v50 = vpop.permute.xlu0 %981  ;;  %3141 = vmatmul.mubr.msk.f32.vlgmr.msra.gmra.mxu0 %vm341_vm2, %v3138_v48 }
 0x13a   : > { %v989_v51 = vsel %vm987_vm9, %v984_v40, %v986_v49  ;;  %v988_v52 = vsel %vm987_vm9, %v982_v50, %v984_v40  ;;  %1152 = vmatprep.mubr.f32.mxu0 %v3379_v8 }
 0x13b   : > { %3143 = vmatprep.subr.msk.mxu1 %vm345_vm1, %v989_v51 }
 0x13c   : > { %3144 = vmatpush1.msk.msra.mxu1 %vm345_vm1, %v988_v52 }
 0x13d   : > { %v1077_v54 = vpop.permute.xlu1 %1076  ;;  %3145 = vmatmul.mubr.msk.f32.vlgmr.msra.gmra.mxu1 %vm341_vm2, %v3142_v53 }
 0x13e   : > { %v1080_v55 = vsel %vm1078_vm10, %v1075_v45, %v1077_v54  ;;  %1278 = vmatprep.mubr.f32.mxu1 %v3379_v8 }
 0x13f   : > { %3147 = vmatprep.subr.msk.mxu0 %vm345_vm1, %v1080_v55 }
 0x141   : > { %v1073_v56 = vpop.permute.xlu1 %1072 }
 0x142   : > { %v1079_v58 = vsel %vm1078_vm10, %v1073_v56, %v1075_v45 }
 0x143   : > { %3148 = vmatpush1.msk.msra.mxu0 %vm345_vm1, %v1079_v58  ;;  %vm1210_vm1 = vcmask 130048  }
 0x144   : > { %3149 = vmatmul.mubr.msk.f32.vlgmr.msra.gmra.mxu0 %vm341_vm2, %v3146_v57 }
 0x145   : > { %1380 = vmatprep.mubr.f32.mxu0 %v3379_v8 }
 0x146   : > { %v1167_v47 = vpop.permute.xlu0 %1166 }
 0x166   : > { %v417_v63 = vpop.f32.mrf.mxu0 }
 0x167   : > { %v422_v5 = vmul.f32 %v417_v63, %v3609_v3 }
 0x168   : > { %v419_v1 = vpop.f32.mrf.mxu0 }
 0x169   : > { %v423_v10 = vmul.f32 %v419_v1, %v3612_v4 }
 0x1e5   : > { %v509_v2 = vpop.f32.mrf.mxu1 }
 0x1e6   : > { %v514_v13 = vadd.f32 %v509_v2, %v422_v5 }
 0x1e7   : > { %v511_v6 = vpop.f32.mrf.mxu1 }
 0x1e8   : > { %v515_v16 = vadd.f32 %v511_v6, %v423_v10 }
 0x1e9   : > { %v600_v7 = vpop.f32.mrf.mxu0 }
 0x1ea   : > { %v605_v14 = vmul.f32 %v600_v7, %v3616_v9 }
 0x1eb   : > { %v602_v12 = vpop.f32.mrf.mxu0 }
 0x1ec   : > { %v606_v17 = vmul.f32 %v602_v12, %v3620_v11  ;;  %v607_v19 = vadd.f32 %v605_v14, %v514_v13  ;;  %v2135_v13 = vld [vmem:[#allocation2] sm:$0xff] }
 0x1ed   : > { %v693_v15 = vpop.f32.mrf.mxu1 }
 0x1ee   : > { %v698_v20 = vmul.f32 %v693_v15, %v3609_v3  ;;  %v608_v22 = vadd.f32 %v606_v17, %v515_v16  ;;  %v1209_v15 = vld [vmem:[%s4073_s3] sm:$0xff] }
 0x1ef   : > { %v695_v18 = vpop.f32.mrf.mxu1  ;;  %v2085_v17 = vld [vmem:[%s4074_s4] sm:$0xff] }
 0x1f0   : > { %v699_v23 = vmul.f32 %v695_v18, %v3612_v4  ;;  %v700_v24 = vadd.f32 %v698_v20, %v607_v19 }
 0x1f1   : > { %v786_v21 = vpop.f32.mrf.mxu0 }
 0x1f2   : > { %v701_v27 = vadd.f32 %v699_v23, %v608_v22  ;;  %v791_v29 = vadd.f32 %v786_v21, %v700_v24 }
 0x1f3   : > { %v788_v25 = vpop.f32.mrf.mxu0 }
 0x1f4   : > { %v792_v32 = vadd.f32 %v788_v25, %v701_v27 }
 0x1f5   : > { %v877_v26 = vpop.f32.mrf.mxu1 }
 0x1f6   : > { %v882_v30 = vmul.f32 %v877_v26, %v3616_v9 }
 0x1f7   : > { %v879_v28 = vpop.f32.mrf.mxu1 }
 0x1f8   : > { %v883_v33 = vmul.f32 %v879_v28, %v3620_v11  ;;  %v884_v35 = vadd.f32 %v882_v30, %v791_v29 }
 0x1f9   : > { %v970_v31 = vpop.f32.mrf.mxu0 }
 0x1fa   : > { %v975_v36 = vmul.f32 %v970_v31, %v3609_v3  ;;  %v885_v37 = vadd.f32 %v883_v33, %v792_v32 }
 0x1fb   : > { %v972_v34 = vpop.f32.mrf.mxu0 }
 0x1fc   : > { %v976_v38 = vmul.f32 %v972_v34, %v3612_v4  ;;  %v977_v40 = vadd.f32 %v975_v36, %v884_v35 }
 0x1fd   : > { %v1063_v39 = vpop.f32.mrf.mxu1 }
 0x1fe   : > { %v978_v41 = vadd.f32 %v976_v38, %v885_v37  ;;  %v1068_v44 = vadd.f32 %v1063_v39, %v977_v40 }
 0x1ff   : > { %v1065_v42 = vpop.f32.mrf.mxu1 }
 0x200   : > { %v1069_v48 = vadd.f32 %v1065_v42, %v978_v41 }
 0x204   : > { %v1154_v43 = vpop.f32.mrf.mxu0 }
 0x205   : > { %v1159_v45 = vmul.f32 %v1154_v43, %v3616_v9 }
 0x206   : > { %v1156_v46 = vpop.f32.mrf.mxu0 }
 0x207   : > { %v1161_v49 = vadd.f32 %v1159_v45, %v1068_v44  ;;  %v1160_v50 = vmul.f32 %v1156_v46, %v3620_v11 }
 0x209   : > { %v1162_v51 = vadd.f32 %v1160_v50, %v1069_v48  ;;  %v3632_v52 = vadd.f32 %v1167_v47, %v1161_v49 }
 0x20b   : > { %v3634_v53 = vadd.f32 %v1167_v47, %v1162_v51  ;;  %v3150_v54 = vmul.f32 -1.442695, %v3632_v52  ;;  %1189 = vrot.lane.b32.xlu0 %v3632_v52, %s3372_s9 }
 0x20d   : > { %3261 = vpow2.f32 %v3150_v54  ;;  %v3151_v55 = vmul.f32 -1.442695, %v3634_v53  ;;  %1191 = vrot.lane.b32.xlu1 %v3634_v53, %s3372_s9 }
 0x20f   : > { %3263 = vpow2.f32 %v3151_v55 }
 0x21a   : > { %v3262_v56 = vpop.eup %3261 }
 0x21b   : > { %v1177_v57 = vadd.f32 1.0, %v3262_v56  ;;  %v3157_v56 = vld [vmem:[%s4073_s3 + $0x8] sm:$0xff] }
 0x21c   : > { %v3264_v58 = vpop.eup %3263 }
 0x21d   : > { %v1178_v59 = vadd.f32 1.0, %v3264_v58  ;;  %3265 = vrcp.f32 %v1177_v57 }
 0x21f   : > { %3267 = vrcp.f32 %v1178_v59 }
 0x22a   : > { %v3266_v60 = vpop.eup %3265 }
 0x22b   : > { %v1183_v61 = vmul.f32 %v3266_v60, %v3632_v52 }
 0x22c   : > { %v3268_v62 = vpop.eup %3267 }
 0x22d   : > { %1193 = vrot.lane.b32.xlu1 %v1183_v61, %s3372_s9  ;;  %v1184_v63 = vmul.f32 %v3268_v62, %v3634_v53 }
 0x231   : > { %1195 = vrot.lane.b32.xlu1 %v1184_v63, %s3372_s9  ;;  %v3159_v63 = vld [vmem:[%s4073_s3 + $0x10] sm:$0xff] }
 0x27d   : > { %v1190_v0 = vpop.permute.xlu0 %1189 }
 0x27e   : > { %v3647_v1 = vsel %vm334_vm0, 0.0, %v1190_v0 }
 0x27f   : > { %v1192_v2 = vpop.permute.xlu1 %1191  ;;  %1293 = vrot.lane.b32.xlu1 %v3647_v1, %s3374_s14 }
 0x280   : > { %v1207_v5 = vsel %vm334_vm0, %v1192_v2, 0.0  ;;  %v1197_v6 = vsel %vm334_vm0, %v1190_v0, %v1192_v2 }
 0x281   : > { %1297 = vrot.lane.b32.xlu0 %v1207_v5, %s3374_s14 }
 0x283   : > { %1391 = vrot.lane.b32.xlu1 %v3647_v1, %s3373_s13 }
 0x285   : > { %1395 = vrot.lane.b32.xlu0 %v1207_v5, %s3373_s13 }
 0x287   : > { %1491 = vrot.lane.b32.xlu1 %v3647_v1, %s3376_s16 }
 0x289   : > { %1495 = vrot.lane.b32.xlu0 %v1207_v5, %s3376_s16 }
 0x28b   : > { %1591 = vrot.lane.b32.xlu1 %v3647_v1, %s3375_s15 }
 0x28d   : > { %1595 = vrot.lane.b32.xlu0 %v1207_v5, %s3375_s15 }
 0x28f   : > { %1689 = vrot.lane.b32.xlu1 %v3647_v1, %s3378_s18 }
 0x291   : > { %1693 = vrot.lane.b32.xlu0 %v1207_v5, %s3378_s18 }
 0x293   : > { %1789 = vrot.lane.b32.xlu1 %v3647_v1, %s3377_s17 }
 0x295   : > { %1793 = vrot.lane.b32.xlu0 %v1207_v5, %s3377_s17 }
 0x297   : > { %1295 = vrot.lane.b32.xlu1 %v1197_v6, %s3374_s14 }
 0x299   : > { %1891 = vrot.lane.b32.xlu0 %v1197_v6, %s3380_s21 }
 0x29b   : > { %1393 = vrot.lane.b32.xlu1 %v1197_v6, %s3373_s13 }
 0x29d   : > { %1989 = vrot.lane.b32.xlu0 %v1197_v6, %s3381_s22 }
 0x29f   : > { %1493 = vrot.lane.b32.xlu1 %v1197_v6, %s3376_s16  ;;  %v1194_v7 = vpop.permute.xlu1 %1193 }
 0x2a0   : > { %v1206_v10 = vsel %vm334_vm0, 0.0, %v1194_v7 }
 0x2a1   : > { %1299 = vrot.lane.b32.xlu0 %v1206_v10, %s3374_s14 }
 0x2a3   : > { %1593 = vrot.lane.b32.xlu1 %v1197_v6, %s3375_s15  ;;  %v1196_v12 = vpop.permute.xlu1 %1195 }
 0x2a4   : > { %v1198_v14 = vsel %vm334_vm0, %v1194_v7, %v1196_v12  ;;  %v1208_v16 = vsel %vm334_vm0, %v1196_v12, 0.0 }
 0x2a5   : > { %1397 = vrot.lane.b32.xlu0 %v1206_v10, %s3373_s13  ;;  %1242 = vmatprep.subr.mxu1 %v1198_v14 }
 0x2a6   : > { %3153 = vmatpush1.msk.msra.mxu1 %vm3678_vm15, %v1194_v7 }
 0x2a7   : > { %1691 = vrot.lane.b32.xlu1 %v1197_v6, %s3378_s18  ;;  %1244 = vmatprep.subr.mxu1 %v1197_v6 }
 0x2a8   : > { %3155 = vmatpush1.msk.msra.mxu1 %vm3678_vm15, %v1190_v0 }
 0x2a9   : > { %1497 = vrot.lane.b32.xlu0 %v1206_v10, %s3376_s16  ;;  %3156 = vmatmul.mubr.msk.f32.vlgmr.msra.gmra.mxu1 %vm1210_vm1, %v1209_v15 }
 0x2aa   : > { %1478 = vmatprep.mubr.f32.mxu1 %v3379_v8 }
 0x2ab   : > { %1791 = vrot.lane.b32.xlu1 %v1197_v6, %s3377_s17 }
 0x2ad   : > { %1597 = vrot.lane.b32.xlu0 %v1206_v10, %s3375_s15 }
 0x2af   : > { %1893 = vrot.lane.b32.xlu1 %v1207_v5, %s3380_s21 }
 0x2b1   : > { %1695 = vrot.lane.b32.xlu0 %v1206_v10, %s3378_s18 }
 0x2b3   : > { %1991 = vrot.lane.b32.xlu1 %v1207_v5, %s3381_s22 }
 0x2b5   : > { %1795 = vrot.lane.b32.xlu0 %v1206_v10, %s3377_s17 }
 0x2b7   : > { %1993 = vrot.lane.b32.xlu1 %v1206_v10, %s3381_s22 }
 0x2b9   : > { %1895 = vrot.lane.b32.xlu0 %v1206_v10, %s3380_s21  ;;  %v3161_v10 = vld [vmem:[%s4073_s3 + $0x18] sm:$0xff] }
 0x2bb   : > { %1303 = vrot.lane.b32.xlu1 %v1208_v16, %s3374_s14 }
 0x2bd   : > { %1301 = vrot.lane.b32.xlu0 %v1198_v14, %s3374_s14 }
 0x2bf   : > { %1399 = vrot.lane.b32.xlu1 %v1198_v14, %s3373_s13 }
 0x2c1   : > { %1401 = vrot.lane.b32.xlu0 %v1208_v16, %s3373_s13 }
 0x2c3   : > { %1499 = vrot.lane.b32.xlu1 %v1198_v14, %s3376_s16 }
 0x2c5   : > { %1501 = vrot.lane.b32.xlu0 %v1208_v16, %s3376_s16 }
 0x2c7   : > { %1599 = vrot.lane.b32.xlu1 %v1198_v14, %s3375_s15 }
 0x2c9   : > { %1601 = vrot.lane.b32.xlu0 %v1208_v16, %s3375_s15 }
 0x2cb   : > { %1697 = vrot.lane.b32.xlu1 %v1198_v14, %s3378_s18 }
 0x2cd   : > { %1699 = vrot.lane.b32.xlu0 %v1208_v16, %s3378_s18 }
 0x2cf   : > { %1797 = vrot.lane.b32.xlu1 %v1198_v14, %s3377_s17 }
 0x2d1   : > { %1799 = vrot.lane.b32.xlu0 %v1208_v16, %s3377_s17 }
 0x2d3   : > { %1899 = vrot.lane.b32.xlu1 %v1208_v16, %s3380_s21 }
 0x2d5   : > { %1897 = vrot.lane.b32.xlu0 %v1198_v14, %s3380_s21 }
 0x2d7   : > { %1997 = vrot.lane.b32.xlu1 %v1208_v16, %s3381_s22 }
 0x2d9   : > { %1995 = vrot.lane.b32.xlu0 %v1198_v14, %s3381_s22 }
 0x2db   : > { %1987 = vrot.lane.b32.xlu1 %v3647_v1, %s3381_s22 }
 0x2dd   : > { %1889 = vrot.lane.b32.xlu0 %v3647_v1, %s3380_s21 }
 0x2e1   : > { %2088 = vperm.xlu0 %3258, %v2085_v17  }
 0x2f1   : > { %v1294_v18 = vpop.permute.xlu1 %1293 }
 0x2f3   : > { %v1298_v19 = vpop.permute.xlu0 %1297 }
 0x2f5   : > { %v1392_v20 = vpop.permute.xlu1 %1391 }
 0x2f7   : > { %v1396_v21 = vpop.permute.xlu0 %1395 }
 0x2f9   : > { %v1492_v22 = vpop.permute.xlu1 %1491 }
 0x2fb   : > { %v1496_v23 = vpop.permute.xlu0 %1495 }
 0x2fd   : > { %v3727_v24 = vpop.permute.xlu1 %1591 }
 0x2ff   : > { %v3729_v25 = vpop.permute.xlu0 %1595 }
 0x301   : > { %v3731_v26 = vpop.permute.xlu1 %1689 }
 0x303   : > { %v3733_v27 = vpop.permute.xlu0 %1693 }
 0x305   : > { %v3735_v28 = vpop.permute.xlu1 %1789 }
 0x307   : > { %v3737_v29 = vpop.permute.xlu0 %1793 }
 0x309   : > { %v1296_v30 = vpop.permute.xlu1 %1295 }
 0x30a   : > { %v1306_v55 = vsel %vm433_vm3, %v1296_v30, %v1298_v19  ;;  %v1305_v57 = vsel %vm433_vm3, %v1294_v18, %v1296_v30  ;;  %v3163_v19 = vld [vmem:[%s4073_s3 + $0x20] sm:$0xff] }
 0x30b   : > { %v3739_v31 = vpop.permute.xlu0 %1891 }
 0x30d   : > { %v1394_v32 = vpop.permute.xlu1 %1393 }
 0x30e   : > { %v1404_v62 = vsel %vm524_vm4, %v1394_v32, %v1396_v21  ;;  %v1403_v0 = vsel %vm524_vm4, %v1392_v20, %v1394_v32 }
 0x30f   : > { %v3741_v33 = vpop.permute.xlu0 %1989 }
 0x311   : > { %v1494_v34 = vpop.permute.xlu1 %1493 }
 0x312   : > { %v1504_v7 = vsel %vm617_vm5, %v1494_v34, %v1496_v23  ;;  %v1503_v12 = vsel %vm617_vm5, %v1492_v22, %v1494_v34 }
 0x313   : > { %v1300_v35 = vpop.permute.xlu0 %1299 }
 0x315   : > { %v1594_v36 = vpop.permute.xlu1 %1593 }
 0x316   : > { %v1604_v18 = vsel %vm710_vm6, %v1594_v36, %v3729_v25  ;;  %v1603_v20 = vsel %vm710_vm6, %v3727_v24, %v1594_v36  ;;  %v3165_v24 = vld [vmem:[%s4073_s3 + $0x28] sm:$0xff] }
 0x317   : > { %v1398_v37 = vpop.permute.xlu0 %1397 }
 0x319   : > { %v3743_v38 = vpop.permute.xlu1 %1691 }
 0x31a   : > { %v1702_v25 = vsel %vm801_vm7, %v3743_v38, %v3733_v27  ;;  %v1701_v32 = vsel %vm801_vm7, %v3731_v26, %v3743_v38  ;;  %v3167_v26 = vld [vmem:[%s4073_s3 + $0x30] sm:$0xff] }
 0x31b   : > { %v1498_v39 = vpop.permute.xlu0 %1497 }
 0x31d   : > { %v3745_v40 = vpop.permute.xlu1 %1791 }
 0x31e   : > { %v1801_v38 = vsel %vm894_vm8, %v3735_v28, %v3745_v40 }
 0x31f   : > { %v1598_v41 = vpop.permute.xlu0 %1597 }
 0x321   : > { %v3747_v42 = vpop.permute.xlu1 %1893 }
 0x323   : > { %v1696_v43 = vpop.permute.xlu0 %1695 }
 0x325   : > { %v3749_v44 = vpop.permute.xlu1 %1991 }
 0x327   : > { %v3751_v45 = vpop.permute.xlu0 %1795 }
 0x329   : > { %v3753_v46 = vpop.permute.xlu1 %1993 }
 0x32b   : > { %v3755_v47 = vpop.permute.xlu0 %1895 }
 0x32d   : > { %v1304_v48 = vpop.permute.xlu1 %1303 }
 0x32f   : > { %v1302_v49 = vpop.permute.xlu0 %1301 }
 0x330   : > { %v1307_v50 = vsel %vm433_vm3, %v1300_v35, %v1302_v49  ;;  %v1308_v51 = vsel %vm433_vm3, %v1302_v49, %v1304_v48 }
 0x331   : > { %1344 = vmatprep.subr.mxu0 %v1308_v51  ;;  %v1400_v54 = vpop.permute.xlu1 %1399 }
 0x332   : > { %1345 = vmatpush1.msra.mxu0 %v1307_v50  ;;  %v1405_v60 = vsel %vm524_vm4, %v1398_v37, %v1400_v54  ;;  %v1802_v37 = vsel %vm894_vm8, %v3745_v40, %v3737_v29  ;;  %v2000_v50 = vsel %vm1078_vm10, %v3741_v33, %v3749_v44 }
 0x333   : > { %v1402_v58 = vpop.permute.xlu0 %1401  ;;  %1346 = vmatprep.subr.mxu0 %v1306_v55 }
 0x334   : > { %1347 = vmatpush1.msra.mxu0 %v1305_v57  ;;  %v1406_v59 = vsel %vm524_vm4, %v1400_v54, %v1402_v58 }
 0x335   : > { %1442 = vmatprep.subr.mxu1 %v1406_v59  ;;  %v1500_v61 = vpop.permute.xlu1 %1499  ;;  %3158 = vmatmul.mubr.msk.f32.vlgmr.msra.gmra.mxu0 %vm1210_vm1, %v3157_v56 }
 0x336   : > { %1443 = vmatpush1.msra.mxu1 %v1405_v60  ;;  %1578 = vmatprep.mubr.f32.mxu0 %v3379_v8  ;;  %v1505_v5 = vsel %vm617_vm5, %v1498_v39, %v1500_v61 }
 0x337   : > { %v1502_v1 = vpop.permute.xlu0 %1501  ;;  %1444 = vmatprep.subr.mxu1 %v1404_v62 }
 0x338   : > { %1445 = vmatpush1.msra.mxu1 %v1403_v0  ;;  %v1506_v2 = vsel %vm617_vm5, %v1500_v61, %v1502_v1 }
 0x339   : > { %1542 = vmatprep.subr.mxu0 %v1506_v2  ;;  %v1600_v6 = vpop.permute.xlu1 %1599  ;;  %3160 = vmatmul.mubr.msk.f32.vlgmr.msra.gmra.mxu1 %vm1210_vm1, %v3159_v63 }
 0x33a   : > { %1543 = vmatpush1.msra.mxu0 %v1505_v5  ;;  %1678 = vmatprep.mubr.f32.mxu1 %v3379_v8  ;;  %v1605_v16 = vsel %vm710_vm6, %v1598_v41, %v1600_v6 }
 0x33b   : > { %v1602_v14 = vpop.permute.xlu0 %1601  ;;  %1544 = vmatprep.subr.mxu0 %v1504_v7 }
 0x33c   : > { %1545 = vmatpush1.msra.mxu0 %v1503_v12  ;;  %v1606_v15 = vsel %vm710_vm6, %v1600_v6, %v1602_v14 }
 0x33d   : > { %1642 = vmatprep.subr.mxu1 %v1606_v15  ;;  %v1698_v17 = vpop.permute.xlu1 %1697  ;;  %3162 = vmatmul.mubr.msk.f32.vlgmr.msra.gmra.mxu0 %vm1210_vm1, %v3161_v10 }
 0x33e   : > { %1643 = vmatpush1.msra.mxu1 %v1605_v16  ;;  %1776 = vmatprep.mubr.f32.mxu0 %v3379_v8  ;;  %v1703_v23 = vsel %vm801_vm7, %v1696_v43, %v1698_v17 }
 0x33f   : > { %v1700_v21 = vpop.permute.xlu0 %1699  ;;  %1644 = vmatprep.subr.mxu1 %v1604_v18 }
 0x340   : > { %1645 = vmatpush1.msra.mxu1 %v1603_v20  ;;  %v1704_v22 = vsel %vm801_vm7, %v1698_v17, %v1700_v21 }
 0x341   : > { %1740 = vmatprep.subr.mxu0 %v1704_v22  ;;  %v1798_v30 = vpop.permute.xlu1 %1797  ;;  %3164 = vmatmul.mubr.msk.f32.vlgmr.msra.gmra.mxu1 %vm1210_vm1, %v3163_v19 }
 0x342   : > { %1741 = vmatpush1.msra.mxu0 %v1703_v23  ;;  %1876 = vmatprep.mubr.f32.mxu1 %v3379_v8  ;;  %v1803_v36 = vsel %vm894_vm8, %v3751_v45, %v1798_v30  ;;  %v1902_v45 = vsel %vm987_vm9, %v3739_v31, %v3747_v42  ;;  %v3171_v42 = vld [vmem:[%s4073_s3 + $0x40] sm:$0xff] }
 0x343   : > { %v1800_v34 = vpop.permute.xlu0 %1799  ;;  %1742 = vmatprep.subr.mxu0 %v1702_v25 }
 0x344   : > { %1743 = vmatpush1.msra.mxu0 %v1701_v32  ;;  %v1804_v35 = vsel %vm894_vm8, %v1798_v30, %v1800_v34 }
 0x345   : > { %1840 = vmatprep.subr.mxu1 %v1804_v35  ;;  %v1900_v27 = vpop.permute.xlu1 %1899  ;;  %3166 = vmatmul.mubr.msk.f32.vlgmr.msra.gmra.mxu0 %vm1210_vm1, %v3165_v24 }
 0x346   : > { %1841 = vmatpush1.msra.mxu1 %v1803_v36  ;;  %1976 = vmatprep.mubr.f32.mxu0 %v3379_v8 }
 0x347   : > { %v1898_v39 = vpop.permute.xlu0 %1897  ;;  %1842 = vmatprep.subr.mxu1 %v1802_v37 }
 0x348   : > { %v1903_v41 = vsel %vm987_vm9, %v3755_v47, %v1898_v39  ;;  %1843 = vmatpush1.msra.mxu1 %v1801_v38  ;;  %v1904_v43 = vsel %vm987_vm9, %v1898_v39, %v1900_v27 }
 0x349   : > { %1940 = vmatprep.subr.mxu0 %v1904_v43  ;;  %v1998_v29 = vpop.permute.xlu1 %1997  ;;  %3168 = vmatmul.mubr.msk.f32.vlgmr.msra.gmra.mxu1 %vm1210_vm1, %v3167_v26 }
 0x34a   : > { %1941 = vmatpush1.msra.mxu0 %v1903_v41  ;;  %2074 = vmatprep.mubr.f32.mxu1 %v3379_v8 }
 0x34b   : > { %v1996_v28 = vpop.permute.xlu0 %1995  ;;  %1942 = vmatprep.subr.mxu0 %v1902_v45 }
 0x34c   : > { %v2001_v40 = vsel %vm1078_vm10, %v3753_v46, %v1996_v28  ;;  %v2002_v47 = vsel %vm1078_vm10, %v1996_v28, %v1998_v29  ;;  %v3169_v46 = vld [vmem:[%s4073_s3 + $0x38] sm:$0xff] }
 0x34d   : > { %2038 = vmatprep.subr.mxu1 %v2002_v47  ;;  %v1988_v48 = vpop.permute.xlu1 %1987 }
 0x34e   : > { %v1999_v49 = vsel %vm1078_vm10, %v1988_v48, %v3741_v33  ;;  %2039 = vmatpush1.msra.mxu1 %v2001_v40 }
 0x34f   : > { %v1890_v51 = vpop.permute.xlu0 %1889  ;;  %2040 = vmatprep.subr.mxu1 %v2000_v50 }
 0x350   : > { %v1901_v54 = vsel %vm987_vm9, %v1890_v51, %v3739_v31  ;;  %2041 = vmatpush1.msra.mxu1 %v1999_v49 }
 0x351   : > { %1943 = vmatpush1.msra.mxu0 %v1901_v54  ;;  %3172 = vmatmul.mubr.msk.f32.vlgmr.msra.gmra.mxu1 %vm1210_vm1, %v3171_v42 }
 0x352   : > { %3170 = vmatmul.mubr.msk.f32.vlgmr.msra.gmra.mxu0 %vm1210_vm1, %v3169_v46  ;;  %2305 = vmatprep.mubr.f32.mxu1 %v3379_v8 }
 0x353   : > { %2203 = vmatprep.mubr.f32.mxu0 %v3379_v8 }
 0x35c   : > { %v2089_v45 = vpop.permute.xlu0 %2088 }
 0x369   : > { %v1280_v33 = vpop.f32.mrf.mxu1 }
 0x36a   : > { %v1285_v56 = vmul.f32 %v1280_v33, %v3609_v3 }
 0x36b   : > { %v1282_v44 = vpop.f32.mrf.mxu1 }
 0x36c   : > { %v1286_v59 = vmul.f32 %v1282_v44, %v3612_v4 }
 0x3f5   : > { %v1382_v55 = vpop.f32.mrf.mxu0 }
 0x3f6   : > { %v1387_v60 = vadd.f32 %v1382_v55, %v1285_v56 }
 0x3f7   : > { %v1384_v57 = vpop.f32.mrf.mxu0 }
 0x3f8   : > { %v1388_v63 = vadd.f32 %v1384_v57, %v1286_v59 }
 0x3f9   : > { %v1480_v58 = vpop.f32.mrf.mxu1 }
 0x3fa   : > { %v1485_v61 = vmul.f32 %v1480_v58, %v3616_v9 }
 0x3fb   : > { %v1482_v31 = vpop.f32.mrf.mxu1 }
 0x3fc   : > { %v1486_v0 = vmul.f32 %v1482_v31, %v3620_v11  ;;  %v1487_v2 = vadd.f32 %v1485_v61, %v1387_v60 }
 0x3fd   : > { %v1580_v62 = vpop.f32.mrf.mxu0 }
 0x3fe   : > { %v1585_v5 = vmul.f32 %v1580_v62, %v3609_v3  ;;  %v1488_v7 = vadd.f32 %v1486_v0, %v1388_v63 }
 0x3ff   : > { %v1582_v1 = vpop.f32.mrf.mxu0 }
 0x400   : > { %v1586_v10 = vmul.f32 %v1582_v1, %v3612_v4  ;;  %v1587_v12 = vadd.f32 %v1585_v5, %v1487_v2  ;;  %v3010_v5 = vld [vmem:[%s4076_s6] sm:$0xff] }
 0x401   : > { %v1680_v6 = vpop.f32.mrf.mxu1 }
 0x402   : > { %v1588_v16 = vadd.f32 %v1586_v10, %v1488_v7  ;;  %v1685_v18 = vadd.f32 %v1680_v6, %v1587_v12 }
 0x403   : > { %v1682_v14 = vpop.f32.mrf.mxu1 }
 0x404   : > { %v1686_v21 = vadd.f32 %v1682_v14, %v1588_v16 }
 0x405   : > { %v1778_v15 = vpop.f32.mrf.mxu0 }
 0x406   : > { %v1783_v19 = vmul.f32 %v1778_v15, %v3616_v9 }
 0x407   : > { %v1780_v17 = vpop.f32.mrf.mxu0 }
 0x408   : > { %v1784_v22 = vmul.f32 %v1780_v17, %v3620_v11  ;;  %v1785_v30 = vadd.f32 %v1783_v19, %v1685_v18 }
 0x409   : > { %v1878_v20 = vpop.f32.mrf.mxu1 }
 0x40a   : > { %v1883_v25 = vmul.f32 %v1878_v20, %v3609_v3  ;;  %v1786_v24 = vadd.f32 %v1784_v22, %v1686_v21 }
 0x40b   : > { %v1880_v23 = vpop.f32.mrf.mxu1 }
 0x40c   : > { %v1884_v32 = vmul.f32 %v1880_v23, %v3612_v4  ;;  %v1885_v34 = vadd.f32 %v1883_v25, %v1785_v30 }
 0x40e   : > { %v1886_v26 = vadd.f32 %v1884_v32, %v1786_v24 }
 0x411   : > { %v2076_v35 = vpop.f32.mrf.mxu1 }
 0x412   : > { %v1978_v36 = vpop.f32.mrf.mxu0  ;;  %v2081_v27 = vmul.f32 %v2076_v35, %v3616_v9 }
 0x413   : > { %v1983_v37 = vadd.f32 %v1978_v36, %v1885_v34  ;;  %v2078_v38 = vpop.f32.mrf.mxu1 }
 0x414   : > { %v1980_v39 = vpop.f32.mrf.mxu0  ;;  %v2082_v41 = vmul.f32 %v2078_v38, %v3620_v11 }
 0x415   : > { %v2083_v43 = vadd.f32 %v2081_v27, %v1983_v37  ;;  %v1984_v29 = vadd.f32 %v1980_v39, %v1886_v26 }
 0x417   : > { %v2091_v28 = vadd.f32 %v2089_v45, %v2083_v43  ;;  %v2084_v40 = vadd.f32 %v2082_v41, %v1984_v29 }
 0x419   : > { %v3173_v47 = vmul.f32 -1.442695, %v2091_v28  ;;  %v2092_v48 = vadd.f32 %v2089_v45, %v2084_v40  ;;  %v2093_v49 = vadd.f32 %v2091_v28, %v3632_v52 }
 0x41b   : > { %3269 = vpow2.f32 %v3173_v47  ;;  %v3174_v50 = vmul.f32 -1.442695, %v2092_v48  ;;  %v2095_v42 = vmul.f32 0.5, %v2093_v49  ;;  %v2094_v51 = vadd.f32 %v2092_v48, %v3634_v53 }
 0x41d   : > { %3271 = vpow2.f32 %v3174_v50  ;;  %2115 = vrot.lane.b32.xlu1 %v2095_v42, %s3372_s9  ;;  %v2096_v46 = vmul.f32 0.5, %v2094_v51  ;;  %v2213_v42 = vld [vmem:[#allocation2 + $0x8] sm:$0xff] }
 0x41f   : > { %2117 = vrot.lane.b32.xlu0 %v2096_v46, %s3372_s9 }
 0x428   : > { %v3270_v54 = vpop.eup %3269 }
 0x429   : > { %v2103_v33 = vadd.f32 1.0, %v3270_v54 }
 0x42a   : > { %v3272_v44 = vpop.eup %3271 }
 0x42b   : > { %3273 = vrcp.f32 %v2103_v33  ;;  %v2104_v55 = vadd.f32 1.0, %v3272_v44 }
 0x42d   : > { %3275 = vrcp.f32 %v2104_v55 }
 0x438   : > { %v3274_v56 = vpop.eup %3273 }
 0x439   : > { %v2109_v57 = vmul.f32 %v3274_v56, %v2091_v28  ;;  %v2315_v56 = vld [vmem:[#allocation2 + $0x10] sm:$0xff] }
 0x43a   : > { %v3276_v52 = vpop.eup %3275 }
 0x43b   : > { %2119 = vrot.lane.b32.xlu1 %v2109_v57, %s3372_s9  ;;  %v2110_v58 = vmul.f32 %v3276_v52, %v2092_v48 }
 0x43d   : > { %2121 = vrot.lane.b32.xlu0 %v2110_v58, %s3372_s9 }
 0x48f   : > { %v2116_v53 = vpop.permute.xlu1 %2115 }
 0x490   : > { %v2131_v59 = vsel %vm334_vm0, 0.0, %v2116_v53 }
 0x491   : > { %2218 = vrot.lane.b32.xlu0 %v2131_v59, %s3374_s14  ;;  %v2118_v31 = vpop.permute.xlu0 %2117 }
 0x492   : > { %v2133_v60 = vsel %vm334_vm0, %v2118_v31, 0.0  ;;  %v2123_v61 = vsel %vm334_vm0, %v2116_v53, %v2118_v31 }
 0x493   : > { %2222 = vrot.lane.b32.xlu1 %v2133_v60, %s3374_s14 }
 0x495   : > { %2316 = vrot.lane.b32.xlu0 %v2131_v59, %s3373_s13 }
 0x497   : > { %2320 = vrot.lane.b32.xlu1 %v2133_v60, %s3373_s13 }
 0x499   : > { %2416 = vrot.lane.b32.xlu0 %v2131_v59, %s3376_s16 }
 0x49b   : > { %2420 = vrot.lane.b32.xlu1 %v2133_v60, %s3376_s16 }
 0x49d   : > { %2516 = vrot.lane.b32.xlu0 %v2131_v59, %s3375_s15 }
 0x49f   : > { %2520 = vrot.lane.b32.xlu1 %v2133_v60, %s3375_s15 }
 0x4a1   : > { %2614 = vrot.lane.b32.xlu0 %v2131_v59, %s3378_s18 }
 0x4a3   : > { %2618 = vrot.lane.b32.xlu1 %v2133_v60, %s3378_s18 }
 0x4a5   : > { %2714 = vrot.lane.b32.xlu0 %v2131_v59, %s3377_s17 }
 0x4a7   : > { %2718 = vrot.lane.b32.xlu1 %v2133_v60, %s3377_s17 }
 0x4a9   : > { %2220 = vrot.lane.b32.xlu0 %v2123_v61, %s3374_s14 }
 0x4ab   : > { %2816 = vrot.lane.b32.xlu1 %v2123_v61, %s3380_s21 }
 0x4ad   : > { %2318 = vrot.lane.b32.xlu0 %v2123_v61, %s3373_s13  ;;  %v2120_v62 = vpop.permute.xlu1 %2119 }
 0x4ae   : > { %v2132_v1 = vsel %vm334_vm0, 0.0, %v2120_v62 }
 0x4af   : > { %2914 = vrot.lane.b32.xlu1 %v2123_v61, %s3381_s22  ;;  %v2122_v63 = vpop.permute.xlu0 %2121 }
 0x4b0   : > { %v2124_v0 = vsel %vm334_vm0, %v2120_v62, %v2122_v63  ;;  %v2134_v2 = vsel %vm334_vm0, %v2122_v63, 0.0 }
 0x4b1   : > { %2418 = vrot.lane.b32.xlu0 %v2123_v61, %s3376_s16  ;;  %2167 = vmatprep.subr.mxu0 %v2124_v0 }
 0x4b2   : > { %3176 = vmatpush1.msk.msra.mxu0 %vm3678_vm15, %v2120_v62 }
 0x4b3   : > { %2224 = vrot.lane.b32.xlu1 %v2132_v1, %s3374_s14  ;;  %2169 = vmatprep.subr.mxu0 %v2123_v61 }
 0x4b4   : > { %3178 = vmatpush1.msk.msra.mxu0 %vm3678_vm15, %v2116_v53 }
 0x4b5   : > { %2518 = vrot.lane.b32.xlu0 %v2123_v61, %s3375_s15  ;;  %3179 = vmatmul.mubr.msk.f32.vlgmr.msra.gmra.mxu0 %vm1210_vm1, %v2135_v13 }
 0x4b6   : > { %2403 = vmatprep.mubr.f32.mxu0 %v3379_v8 }
 0x4b7   : > { %2322 = vrot.lane.b32.xlu1 %v2132_v1, %s3373_s13 }
 0x4b9   : > { %2616 = vrot.lane.b32.xlu0 %v2123_v61, %s3378_s18 }
 0x4bb   : > { %2422 = vrot.lane.b32.xlu1 %v2132_v1, %s3376_s16 }
 0x4bd   : > { %2716 = vrot.lane.b32.xlu0 %v2123_v61, %s3377_s17 }
 0x4bf   : > { %2522 = vrot.lane.b32.xlu1 %v2132_v1, %s3375_s15 }
 0x4c1   : > { %2818 = vrot.lane.b32.xlu0 %v2133_v60, %s3380_s21 }
 0x4c3   : > { %2620 = vrot.lane.b32.xlu1 %v2132_v1, %s3378_s18 }
 0x4c5   : > { %2916 = vrot.lane.b32.xlu0 %v2133_v60, %s3381_s22  ;;  %v2415_v60 = vld [vmem:[#allocation2 + $0x18] sm:$0xff] }
 0x4c7   : > { %2720 = vrot.lane.b32.xlu1 %v2132_v1, %s3377_s17 }
 0x4c9   : > { %2918 = vrot.lane.b32.xlu0 %v2132_v1, %s3381_s22 }
 0x4cb   : > { %2820 = vrot.lane.b32.xlu1 %v2132_v1, %s3380_s21 }
 0x4cd   : > { %2228 = vrot.lane.b32.xlu0 %v2134_v2, %s3374_s14 }
 0x4cf   : > { %2226 = vrot.lane.b32.xlu1 %v2124_v0, %s3374_s14  ;;  %s284_s14 = sand.u32 1, %s3359_s25  }
 0x4d0   : > { %s3021_s20 = scalar_lea.sflag [#allocation4], %s284_s14 }
 0x4d1   : > { %2324 = vrot.lane.b32.xlu0 %v2124_v0, %s3373_s13 }
 0x4d3   : > { %2326 = vrot.lane.b32.xlu1 %v2134_v2, %s3373_s13 }
 0x4d5   : > { %2424 = vrot.lane.b32.xlu0 %v2124_v0, %s3376_s16 }
 0x4d7   : > { %2426 = vrot.lane.b32.xlu1 %v2134_v2, %s3376_s16  ;;  %s3194_s16 = sshll.u32 %s3445_s28, 8  ;;  %s3307_s28 = sshll.u32 %s3383_s29, 4  ;;  %s3308_s28 = int_to_ptr.vmem [resolvable:$false] %s3307_s28 }
 0x4d8   : > { %s3033_s19 = scalar_lea.hbm %s4077_s7, %s3194_s16  ;;  %s3309_s8 = scalar_lea.vmem %s3308_s28, 512 }
 0x4d9   : > { %2524 = vrot.lane.b32.xlu0 %v2124_v0, %s3375_s15 }
 0x4db   : > { %2526 = vrot.lane.b32.xlu1 %v2134_v2, %s3375_s15  ;;  %s3112_s15 = sshll.u32 %s284_s14, 4 }
 0x4dd   : > { %2622 = vrot.lane.b32.xlu0 %v2124_v0, %s3378_s18 }
 0x4df   : > { %2624 = vrot.lane.b32.xlu1 %v2134_v2, %s3378_s18 }
 0x4e1   : > { %2722 = vrot.lane.b32.xlu0 %v2124_v0, %s3377_s17 }
 0x4e3   : > { %2724 = vrot.lane.b32.xlu1 %v2134_v2, %s3377_s17  ;;  %s286_s17 = scalar_lea.vmem [#allocation5], %s3112_s15 }
 0x4e4   : > { %s3035_s18 = sshll.u32 %s286_s17, 4  ;;  %s3036_s18 = int_to_ptr.vmem [resolvable:$true] %s3035_s18 }
 0x4e5   : > { %2824 = vrot.lane.b32.xlu0 %v2134_v2, %s3380_s21  ;;  %s3303_s23 = scalar_lea.vmem %s3036_s18, 256  ;;  %p3310_p11 = scmp.lt.s32.totalorder %s3036_s18, %s3308_s28 }
 0x4e6   : > { %p3304_p6 = scmp.ne.s32.totalorder %s3036_s18, %s3303_s23  ;;  %p3311_p12 = scmp.lt.s32.totalorder %s3309_s8, %s3303_s23 }
 0x4e7   : > { %2822 = vrot.lane.b32.xlu1 %v2124_v0, %s3380_s21 }
 0x4e8   : > { %p3305_p9 = pnand %p3304_p6, %p3462_p5  ;;  %p3312_p13 = por %p3311_p12, %p3310_p11 }
 0x4e9   : > { %2922 = vrot.lane.b32.xlu0 %v2134_v2, %s3381_s22  ;;  %v2515_v2 = vld [vmem:[#allocation2 + $0x20] sm:$0xff] }
 0x4ea   : > { %p3306_p10 = pneg %p3305_p9 }
 0x4eb   : > { %2920 = vrot.lane.b32.xlu1 %v2124_v0, %s3381_s22 }
 0x4ec   : > { %p3313_p0 = pnand %p3312_p13, %p3306_p10 }
 0x4ed   : > { %2912 = vrot.lane.b32.xlu0 %v2131_v59, %s3381_s22 }
 0x4ef   : > { %2814 = vrot.lane.b32.xlu1 %v2131_v59, %s3380_s21 }
 0x4f3   : > { %3013 = vperm.xlu1 %3259, %v3010_v5  }
 0x503   : > { %v2219_v6 = vpop.permute.xlu0 %2218 }
 0x505   : > { %v2223_v7 = vpop.permute.xlu1 %2222 }
 0x507   : > { %v2317_v10 = vpop.permute.xlu0 %2316 }
 0x509   : > { %v2321_v12 = vpop.permute.xlu1 %2320 }
 0x50b   : > { %v2417_v14 = vpop.permute.xlu0 %2416 }
 0x50d   : > { %v2421_v15 = vpop.permute.xlu1 %2420 }
 0x50f   : > { %v3929_v16 = vpop.permute.xlu0 %2516 }
 0x511   : > { %v3931_v17 = vpop.permute.xlu1 %2520 }
 0x513   : > { %v3933_v18 = vpop.permute.xlu0 %2614 }
 0x515   : > { %v3935_v19 = vpop.permute.xlu1 %2618 }
 0x517   : > { %v3937_v20 = vpop.permute.xlu0 %2714 }
 0x519   : > { %v3939_v21 = vpop.permute.xlu1 %2718 }
 0x51b   : > { %v2221_v22 = vpop.permute.xlu0 %2220 }
 0x51c   : > { %v2231_v50 = vsel %vm433_vm3, %v2221_v22, %v2223_v7  ;;  %v2230_v51 = vsel %vm433_vm3, %v2219_v6, %v2221_v22 }
 0x51d   : > { %v3941_v23 = vpop.permute.xlu1 %2816 }
 0x51f   : > { %v2319_v30 = vpop.permute.xlu0 %2318 }
 0x520   : > { %v2329_v55 = vsel %vm524_vm4, %v2319_v30, %v2321_v12  ;;  %v2328_v57 = vsel %vm524_vm4, %v2317_v10, %v2319_v30 }
 0x521   : > { %v3943_v25 = vpop.permute.xlu1 %2914 }
 0x523   : > { %v2419_v24 = vpop.permute.xlu0 %2418 }
 0x524   : > { %v2429_v31 = vsel %vm617_vm5, %v2419_v24, %v2421_v15  ;;  %v2428_v61 = vsel %vm617_vm5, %v2417_v14, %v2419_v24  ;;  %v2613_v15 = vld [vmem:[#allocation2 + $0x28] sm:$0xff] }
 0x525   : > { %v2225_v32 = vpop.permute.xlu1 %2224 }
 0x527   : > { %v2519_v34 = vpop.permute.xlu0 %2518 }
 0x528   : > { %v2529_v13 = vsel %vm710_vm6, %v2519_v34, %v3931_v17  ;;  %v2528_v5 = vsel %vm710_vm6, %v3929_v16, %v2519_v34 }
 0x529   : > { %v2323_v35 = vpop.permute.xlu1 %2322 }
 0x52b   : > { %v3945_v36 = vpop.permute.xlu0 %2616 }
 0x52c   : > { %v2627_v14 = vsel %vm801_vm7, %v3945_v36, %v3935_v19  ;;  %v2626_v16 = vsel %vm801_vm7, %v3933_v18, %v3945_v36 }
 0x52d   : > { %v2423_v27 = vpop.permute.xlu1 %2422 }
 0x52f   : > { %v3947_v37 = vpop.permute.xlu0 %2716 }
 0x530   : > { %v2727_v19 = vsel %vm894_vm8, %v3947_v37, %v3939_v21  ;;  %v2726_v18 = vsel %vm894_vm8, %v3937_v20, %v3947_v37 }
 0x531   : > { %v2523_v26 = vpop.permute.xlu1 %2522 }
 0x533   : > { %v3949_v38 = vpop.permute.xlu0 %2818 }
 0x534   : > { %v2827_v21 = vsel %vm987_vm9, %v3941_v23, %v3949_v38  ;;  %v2911_v38 = vld [vmem:[#allocation2 + $0x40] sm:$0xff] }
 0x535   : > { %v2621_v39 = vpop.permute.xlu1 %2620 }
 0x537   : > { %v3951_v41 = vpop.permute.xlu0 %2916 }
 0x539   : > { %v3953_v43 = vpop.permute.xlu1 %2720 }
 0x53b   : > { %v3955_v29 = vpop.permute.xlu0 %2918 }
 0x53d   : > { %v3957_v45 = vpop.permute.xlu1 %2820 }
 0x53f   : > { %v2229_v28 = vpop.permute.xlu0 %2228 }
 0x541   : > { %v2227_v40 = vpop.permute.xlu1 %2226 }
 0x542   : > { %v2232_v47 = vsel %vm433_vm3, %v2225_v32, %v2227_v40  ;;  %v2233_v48 = vsel %vm433_vm3, %v2227_v40, %v2229_v28  ;;  %v2713_v32 = vld [vmem:[#allocation2 + $0x30] sm:$0xff] }
 0x543   : > { %2269 = vmatprep.subr.mxu1 %v2233_v48  ;;  %v2325_v49 = vpop.permute.xlu0 %2324 }
 0x544   : > { %2270 = vmatpush1.msra.mxu1 %v2232_v47  ;;  %v2330_v33 = vsel %vm524_vm4, %v2323_v35, %v2325_v49 }
 0x545   : > { %v2327_v46 = vpop.permute.xlu1 %2326  ;;  %2271 = vmatprep.subr.mxu1 %v2231_v50 }
 0x546   : > { %2272 = vmatpush1.msra.mxu1 %v2230_v51  ;;  %v2331_v54 = vsel %vm524_vm4, %v2325_v49, %v2327_v46 }
 0x547   : > { %2367 = vmatprep.subr.mxu0 %v2331_v54  ;;  %v2425_v44 = vpop.permute.xlu0 %2424  ;;  %3180 = vmatmul.mubr.msk.f32.vlgmr.msra.gmra.mxu1 %vm1210_vm1, %v2213_v42 }
 0x548   : > { %2368 = vmatpush1.msra.mxu0 %v2330_v33  ;;  %2503 = vmatprep.mubr.f32.mxu1 %v3379_v8  ;;  %v2430_v53 = vsel %vm617_vm5, %v2423_v27, %v2425_v44 }
 0x549   : > { %v2427_v52 = vpop.permute.xlu1 %2426  ;;  %2369 = vmatprep.subr.mxu0 %v2329_v55 }
 0x54a   : > { %2370 = vmatpush1.msra.mxu0 %v2328_v57  ;;  %v2431_v58 = vsel %vm617_vm5, %v2425_v44, %v2427_v52 }
 0x54b   : > { %2467 = vmatprep.subr.mxu1 %v2431_v58  ;;  %v2525_v59 = vpop.permute.xlu0 %2524  ;;  %3181 = vmatmul.mubr.msk.f32.vlgmr.msra.gmra.mxu0 %vm1210_vm1, %v2315_v56 }
 0x54c   : > { %2468 = vmatpush1.msra.mxu1 %v2430_v53  ;;  %2603 = vmatprep.mubr.f32.mxu0 %v3379_v8  ;;  %v2530_v0 = vsel %vm710_vm6, %v2523_v26, %v2525_v59 }
 0x54d   : > { %v2527_v62 = vpop.permute.xlu1 %2526  ;;  %2469 = vmatprep.subr.mxu1 %v2429_v31 }
 0x54e   : > { %2470 = vmatpush1.msra.mxu1 %v2428_v61  ;;  %v2531_v63 = vsel %vm710_vm6, %v2525_v59, %v2527_v62 }
 0x54f   : > { %2567 = vmatprep.subr.mxu0 %v2531_v63  ;;  %v2623_v1 = vpop.permute.xlu0 %2622  ;;  %3182 = vmatmul.mubr.msk.f32.vlgmr.msra.gmra.mxu1 %vm1210_vm1, %v2415_v60 }
 0x550   : > { %2568 = vmatpush1.msra.mxu0 %v2530_v0  ;;  %2701 = vmatprep.mubr.f32.mxu1 %v3379_v8  ;;  %v2628_v10 = vsel %vm801_vm7, %v2621_v39, %v2623_v1 }
 0x551   : > { %v2625_v6 = vpop.permute.xlu1 %2624  ;;  %2569 = vmatprep.subr.mxu0 %v2529_v13 }
 0x552   : > { %2570 = vmatpush1.msra.mxu0 %v2528_v5  ;;  %v2629_v7 = vsel %vm801_vm7, %v2623_v1, %v2625_v6 }
 0x553   : > { %2665 = vmatprep.subr.mxu1 %v2629_v7  ;;  %v2723_v12 = vpop.permute.xlu0 %2722  ;;  %3183 = vmatmul.mubr.msk.f32.vlgmr.msra.gmra.mxu0 %vm1210_vm1, %v2515_v2 }
 0x554   : > { %2666 = vmatpush1.msra.mxu1 %v2628_v10  ;;  %2801 = vmatprep.mubr.f32.mxu0 %v3379_v8  ;;  %v2728_v30 = vsel %vm894_vm8, %v3953_v43, %v2723_v12 }
 0x555   : > { %v2725_v17 = vpop.permute.xlu1 %2724  ;;  %2667 = vmatprep.subr.mxu1 %v2627_v14 }
 0x556   : > { %2668 = vmatpush1.msra.mxu1 %v2626_v16  ;;  %v2729_v22 = vsel %vm894_vm8, %v2723_v12, %v2725_v17 }
 0x557   : > { %2765 = vmatprep.subr.mxu0 %v2729_v22  ;;  %v2825_v24 = vpop.permute.xlu0 %2824  ;;  %3184 = vmatmul.mubr.msk.f32.vlgmr.msra.gmra.mxu1 %vm1210_vm1, %v2613_v15 }
 0x558   : > { %2766 = vmatpush1.msra.mxu0 %v2728_v30  ;;  %2901 = vmatprep.mubr.f32.mxu1 %v3379_v8 }
 0x559   : > { %v2823_v34 = vpop.permute.xlu1 %2822  ;;  %2767 = vmatprep.subr.mxu0 %v2727_v19 }
 0x55a   : > { %v2828_v35 = vsel %vm987_vm9, %v3957_v45, %v2823_v34  ;;  %2768 = vmatpush1.msra.mxu0 %v2726_v18  ;;  %v2829_v36 = vsel %vm987_vm9, %v2823_v34, %v2825_v24  ;;  %v2925_v45 = vsel %vm1078_vm10, %v3943_v25, %v3951_v41 }
 0x55b   : > { %2865 = vmatprep.subr.mxu1 %v2829_v36  ;;  %v2923_v27 = vpop.permute.xlu0 %2922  ;;  %3185 = vmatmul.mubr.msk.f32.vlgmr.msra.gmra.mxu0 %vm1210_vm1, %v2713_v32 }
 0x55c   : > { %2866 = vmatpush1.msra.mxu1 %v2828_v35  ;;  %2999 = vmatprep.mubr.f32.mxu0 %v3379_v8  ;;  %v2813_v8 = vld [vmem:[#allocation2 + $0x38] sm:$0xff] }
 0x55d   : > { %v2921_v20 = vpop.permute.xlu1 %2920  ;;  %2867 = vmatprep.subr.mxu1 %v2827_v21 }
 0x55e   : > { %v2926_v37 = vsel %vm1078_vm10, %v3955_v29, %v2921_v20  ;;  %v2927_v26 = vsel %vm1078_vm10, %v2921_v20, %v2923_v27 }
 0x55f   : > { %2963 = vmatprep.subr.mxu0 %v2927_v26  ;;  %v2913_v39 = vpop.permute.xlu0 %2912 }
 0x560   : > { %v2924_v43 = vsel %vm1078_vm10, %v2913_v39, %v3943_v25  ;;  %2964 = vmatpush1.msra.mxu0 %v2926_v37 }
 0x561   : > { %v2815_v28 = vpop.permute.xlu1 %2814  ;;  %2965 = vmatprep.subr.mxu0 %v2925_v45 }
 0x562   : > { %v2826_v40 = vsel %vm987_vm9, %v2815_v28, %v3941_v23  ;;  %2966 = vmatpush1.msra.mxu0 %v2924_v43 }
 0x563   : > { %2868 = vmatpush1.msra.mxu1 %v2826_v40  ;;  %3187 = vmatmul.mubr.msk.f32.vlgmr.msra.gmra.mxu0 %vm1210_vm1, %v2911_v38 }
 0x564   : > { %3186 = vmatmul.mubr.msk.f32.vlgmr.msra.gmra.mxu1 %vm1210_vm1, %v2813_v8 }
 0x56e   : > { %v3014_v32 = vpop.permute.xlu1 %3013 }
 0x575   : > { %v2205_v29 = vpop.f32.mrf.mxu0 }
 0x576   : > { %v2210_v49 = vmul.f32 %v2205_v29, %v3609_v3 }
 0x577   : > { %v2207_v47 = vpop.f32.mrf.mxu0 }
 0x578   : > { %v2211_v41 = vmul.f32 %v2207_v47, %v3612_v4 }
 0x607   : > { %v2307_v48 = vpop.f32.mrf.mxu1 }
 0x608   : > { %v2312_v51 = vadd.f32 %v2307_v48, %v2210_v49 }
 0x609   : > { %v2309_v50 = vpop.f32.mrf.mxu1 }
 0x60a   : > { %v2313_v54 = vadd.f32 %v2309_v50, %v2211_v41 }
 0x60b   : > { %v2405_v25 = vpop.f32.mrf.mxu0 }
 0x60c   : > { %v2410_v46 = vmul.f32 %v2405_v25, %v3616_v9 }
 0x60d   : > { %v2407_v42 = vpop.f32.mrf.mxu0 }
 0x60e   : > { %v2411_v33 = vmul.f32 %v2407_v42, %v3620_v11  ;;  %v2412_v55 = vadd.f32 %v2410_v46, %v2312_v51 }
 0x60f   : > { %v2505_v23 = vpop.f32.mrf.mxu1 }
 0x610   : > { %v2510_v56 = vmul.f32 %v2505_v23, %v3609_v3  ;;  %v2413_v52 = vadd.f32 %v2411_v33, %v2313_v54 }
 0x611   : > { %v2507_v44 = vpop.f32.mrf.mxu1 }
 0x612   : > { %v2511_v58 = vmul.f32 %v2507_v44, %v3612_v4  ;;  %v2512_v53 = vadd.f32 %v2510_v56, %v2412_v55 }
 0x613   : > { %v2605_v57 = vpop.f32.mrf.mxu0 }
 0x614   : > { %v2513_v60 = vadd.f32 %v2511_v58, %v2413_v52  ;;  %v2610_v62 = vadd.f32 %v2605_v57, %v2512_v53 }
 0x615   : > { %v2607_v59 = vpop.f32.mrf.mxu0 }
 0x616   : > { %v2611_v1 = vadd.f32 %v2607_v59, %v2513_v60 }
 0x617   : > { %v2703_v31 = vpop.f32.mrf.mxu1 }
 0x618   : > { %v2708_v63 = vmul.f32 %v2703_v31, %v3616_v9 }
 0x619   : > { %v2705_v61 = vpop.f32.mrf.mxu1 }
 0x61a   : > { %v2709_v13 = vmul.f32 %v2705_v61, %v3620_v11  ;;  %v2710_v5 = vadd.f32 %v2708_v63, %v2610_v62 }
 0x61b   : > { %v2803_v0 = vpop.f32.mrf.mxu0 }
 0x61c   : > { %v2808_v6 = vmul.f32 %v2803_v0, %v3609_v3  ;;  %v2711_v7 = vadd.f32 %v2709_v13, %v2611_v1 }
 0x61d   : > { %v2805_v2 = vpop.f32.mrf.mxu0 }
 0x61e   : > { %v2809_v10 = vmul.f32 %v2805_v2, %v3612_v4  ;;  %v2810_v12 = vadd.f32 %v2808_v6, %v2710_v5 }
 0x620   : > { %v2811_v22 = vadd.f32 %v2809_v10, %v2711_v7 }
 0x623   : > { %v3001_v14 = vpop.f32.mrf.mxu0 }
 0x624   : > { %v2903_v15 = vpop.f32.mrf.mxu1  ;;  %v3006_v16 = vmul.f32 %v3001_v14, %v3616_v9 }
 0x625   : > { %v2908_v17 = vadd.f32 %v2903_v15, %v2810_v12  ;;  %v3003_v30 = vpop.f32.mrf.mxu0 }
 0x626   : > { %v2905_v24 = vpop.f32.mrf.mxu1  ;;  %v3007_v19 = vmul.f32 %v3003_v30, %v3620_v11 }
 0x627   : > { %v2909_v3 = vadd.f32 %v2905_v24, %v2811_v22  ;;  %v3008_v18 = vadd.f32 %v3006_v16, %v2908_v17 }
 0x629   : > { %v3009_v4 = vadd.f32 %v3007_v19, %v2909_v3  ;;  %v3016_v34 = vadd.f32 %v3014_v32, %v3008_v18 }
 0x62b   : > { %v3017_v35 = vadd.f32 %v3014_v32, %v3009_v4  ;;  %3018 = vst [vmem:[%s286_s17] sm:$0xff] %v3016_v34 }
 0x62d   : > { %3019 = vst [vmem:[%s286_s17 + $0x8] sm:$0xff] %v3017_v35 }
 0x62e   : > { %3316 = shalt.err (!%p3313_p0)
}
 0x62f   : > { %s3317_s9 = scalar_lea.hbm %s3033_s19, 256  ;;  %s3321_s15 = scalar_lea.hbm %s4077_s7, 512 }
 0x630   : > { %p3318_p1 = scmp.ne.s32.totalorder %s3033_s19, %s3317_s9  ;;  %p3322_p4 = scmp.lt.s32.totalorder %s3033_s19, %s4077_s7 }
 0x631   : > { %p3323_p7 = scmp.lt.s32.totalorder %s3321_s15, %s3317_s9 }
 0x632   : > { %p3319_p2 = pnand %p3318_p1, %p3462_p5 }
 0x633   : > { %p3324_p8 = por %p3323_p7, %p3322_p4 }
 0x634   : > { %p3320_p3 = pneg %p3319_p2 }
 0x636   : > { %p3325_p6 = pnand %p3324_p8, %p3320_p3 }
 0x638   : > { %3328 = shalt.err (!%p3325_p6)
}
 0x639   : > { %3199 = dma.vmem_to_hbm [thread:$0]  (%p3462_p5), %s3036_s18, 256, %s3033_s19, %s3021_s20  }
 0x63a PF: > { %p3211_p9 = scmp.ge.s32.totalorder %s3367_s27, 2  ;;  %s3047_s21 = sand.u32 1, %s3355_s24  }
 0x63b   : > { %p4083_p10 = scmp.ne.s32.totalorder %s4079_s12, 0  ;;  %s3048_s22 = scalar_lea.sflag [#allocation4], %s3047_s21 }
 0x63d   : > { %p3206_p11 = pnand %p3211_p9, %p4083_p10 }
 0x63f   : > { %p3207_p12 = pneg %p3206_p11 }
 0x641   : > { %3350 = dma.done.wait (%p3207_p12), %s3048_s22, 256  }
 0x642   : > { %3352 = vsyncadd (%p3207_p12), %s3048_s22, 4294967040  ;;  %p18_p13 = scmp.ge.s32.totalorder %s3449_s30, 4   ;;  %s4084_s24 = smov %s3359_s25 }
 0x643   : > { %s4085_s25 = smov %s3363_s26  ;;  %s4086_s26 = smov %s3460_s10 }
 0x644   : > { %s4087_s27 = smov %s3449_s30  ;;  %20 = sbr.rel (!%p18_p13) target bundleno = 4 (0x4), region = 112 }
 0x649   :  { %3053 = vsyncpa [#allocation3], 1 }
 0x64a   :  { %3055 = vsyncpa [#allocation3 + $0x1], 1 }
 0x64b   :  { %3056 = vsyncpa [#allocation4], 1 }
 0x64c   :  { %3058 = vsyncpa [#allocation4 + $0x1], 1 }

</bundles_post_ra>
